<compile_context>
chip_gen: v7x
topology: tpu7x:2x2x1
jax: 0.10.0
libtpu: 0.0.40
codegen_flags: <defaults>
</compile_context>

<pallas_src>
import jax
import jax.numpy as jnp
from jax.experimental import pallas as pl
from jax.experimental.pallas import tpu as pltpu


def _round_up(v, m):
    return ((v + m - 1) // m) * m


def _choose_tm(batch, tm_max=512):
    """Big batch tiles (amortize per-step overhead, feed the MXU), but keep
    >= 2 grid steps when the batch allows it so v7x's 2 TCs both get work."""
    if batch >= 2 * tm_max:
        return tm_max
    if batch >= 16:
        return min(tm_max, _round_up((batch + 1) // 2, 8))
    return _round_up(max(batch, 1), 8)


def _make_kernel(depth, mxu_dtype):
    """Kernel computing `depth` fused (h @ W_t + b -> ReLU) stages."""
    n_rest = depth - 1

    def kernel(x_ref, w0_ref, b0_ref, *rest):
        o_ref = rest[-1]
        h = x_ref[...].astype(mxu_dtype)                     # (TM, D_in)
        acc = jnp.dot(h, w0_ref[...], preferred_element_type=jnp.float32)
        act = jnp.maximum(acc + b0_ref[...], 0.0)            # f32 epilogue
        if n_rest > 0:
            wr_ref, br_ref = rest[0], rest[1]                # (L-1,H,H),(L-1,1,H)
            for l in range(n_rest):
                h = act.astype(mxu_dtype)                    # narrow between stages
                acc = jnp.dot(h, wr_ref[l], preferred_element_type=jnp.float32)
                act = jnp.maximum(acc + br_ref[l], 0.0)
        o_ref[...] = act.astype(o_ref.dtype)

    return kernel


def encoder_layer(x, weights, biases, *, tm=None, mxu_dtype=jnp.bfloat16,
                  out_dtype=jnp.float32):
    """Fused Encoder_layer forward.

    x:       (B, D_in) f32 (or bf16)
    weights: list of PyTorch-layout nn.Linear weights; weights[0] is
             (H, D_in), weights[1:] are clones of shape (H, H)
    biases:  list of (H,) arrays
    """
    B, D_in = x.shape
    depth = len(weights)
    assert depth >= 1 and len(biases) == depth
    prev = D_in
    for w, b in zip(weights, biases):
        do, di = w.shape
        assert di == prev and b.shape == (do,), "layer dims do not chain"
        prev = do
    H = weights[0].shape[0]
    for w in weights[1:]:
        assert w.shape == (H, H), "sequential encoders must be (H, H) clones"
    D_out = prev

    if tm is None:
        tm = _choose_tm(B)
    tm = max(8, _round_up(min(tm, max(B, 1)), 8))
    Bp = _round_up(B, tm)

    # Halve streamed input bytes on the bf16 path (no-op on the f32 path).
    x_feed = x.astype(mxu_dtype)
    if Bp != B:
        x_feed = jnp.pad(x_feed, ((0, Bp - B), (0, 0)))

    # One-time wrapper-side transpose + cast: kernel uses the natural
    # ((1,),(0,)) contraction -> no per-step XLU transpose / VPU weight cast.
    w0 = jnp.asarray(weights[0]).T.astype(mxu_dtype)                    # (D_in, H)
    b0 = jnp.asarray(biases[0]).reshape(1, H).astype(jnp.float32)       # (1, H)

    args = [x_feed, w0, b0]
    in_specs = [
        pl.BlockSpec((tm, D_in), lambda i: (i, 0)),
        pl.BlockSpec((D_in, H), lambda i: (0, 0)),     # grid-invariant
        pl.BlockSpec((1, H), lambda i: (0, 0)),        # grid-invariant
    ]
    if depth >= 2:
        w_rest = jnp.stack([jnp.asarray(w).T for w in weights[1:]]).astype(mxu_dtype)
        b_rest = jnp.stack([jnp.asarray(b).reshape(1, H) for b in biases[1:]]
                           ).astype(jnp.float32)
        args += [w_rest, b_rest]
        in_specs += [
            pl.BlockSpec((depth - 1, H, H), lambda i: (0, 0, 0)),
            pl.BlockSpec((depth - 1, 1, H), lambda i: (0, 0, 0)),
        ]

    out = pl.pallas_call(
        _make_kernel(depth, mxu_dtype),
        out_shape=jax.ShapeDtypeStruct((Bp, D_out), out_dtype),
        grid=(Bp // tm,),
        in_specs=in_specs,
        out_specs=pl.BlockSpec((tm, D_out), lambda i: (i, 0)),
        compiler_params=pltpu.CompilerParams(
            dimension_semantics=("parallel",),
            vmem_limit_bytes=32 << 20,
        ),
    )(*args)
    return out[:B] if Bp != B else out


def encoder_layer_ref(x, weights, biases, mxu_dtype=jnp.float32):
    """Pure-JAX reference with the same dtype policy as the kernel."""
    h = x
    for w, b in zip(weights, biases):
        acc = jnp.dot(h.astype(mxu_dtype), jnp.asarray(w).T.astype(mxu_dtype),
                      preferred_element_type=jnp.float32)
        h = jnp.maximum(acc + jnp.asarray(b)[None, :].astype(jnp.float32), 0.0)
    return h


def _make_params(key, dims):
    """PyTorch-style Linear init: U(-1/sqrt(fan_in), +1/sqrt(fan_in))."""
    weights, biases = [], []
    prev = dims[0]
    keys = jax.random.split(key, len(dims) - 1)
    for l, do in enumerate(dims[1:]):
        bound = 1.0 / (prev ** 0.5)
        kw, kb = jax.random.split(keys[l])
        weights.append(jax.random.uniform(
            kw, (do, prev), minval=-bound, maxval=bound, dtype=jnp.float32))
        biases.append(jax.random.uniform(
            kb, (do,), minval=-bound, maxval=bound, dtype=jnp.float32))
        prev = do
    return weights, biases


if __name__ == "__main__":
    root = jax.random.PRNGKey(0)
    k1, k2, k3 = jax.random.split(root, 3)

    # ---- Case 1: main shape (large lane-dense tiles, 2 grid steps) --------
    B, D, depth = 1024, 128, 2
    kx, kp = jax.random.split(k1)
    weights, biases = _make_params(kp, [D] * (depth + 1))
    x = jax.random.normal(kx, (B, D), dtype=jnp.float32)

    # Exact-semantics path (f32 MXU feed) vs f32 reference.
    out_f32 = jax.block_until_ready(
        encoder_layer(x, weights, biases, mxu_dtype=jnp.float32))
    ref_f32 = encoder_layer_ref(x, weights, biases, mxu_dtype=jnp.float32)
    assert out_f32.shape == (B, D)
    assert jnp.allclose(out_f32, ref_f32, atol=2e-5, rtol=2e-5), "f32 path mismatch"

    # Perf path (bf16 MXU feed, f32 accumulate).
    out_bf16 = jax.block_until_ready(
        encoder_layer(x, weights, biases, mxu_dtype=jnp.bfloat16))
    ref_bf16 = encoder_layer_ref(x, weights, biases, mxu_dtype=jnp.bfloat16)
    assert jnp.allclose(out_bf16, ref_bf16, atol=2e-3, rtol=2e-3), "bf16 path mismatch"
    assert jnp.allclose(out_bf16, ref_f32, atol=5e-2, rtol=5e-2), "bf16 vs f32 drift"

    # ---- Case 2: batch not a tile multiple, non-square first layer, depth=3
    B2, D_in2, H2, depth2 = 20, 256, 128, 3
    kx2, kp2 = jax.random.split(k2)
    w2, b2 = _make_params(kp2, [D_in2] + [H2] * depth2)
    x2 = jax.random.normal(kx2, (B2, D_in2), dtype=jnp.float32)
    out2 = jax.block_until_ready(encoder_layer(x2, w2, b2, mxu_dtype=jnp.float32))
    ref2 = encoder_layer_ref(x2, w2, b2, mxu_dtype=jnp.float32)
    assert out2.shape == (B2, H2)
    assert jnp.allclose(out2, ref2, atol=2e-5, rtol=2e-5), "padded path mismatch"

    # ---- Case 3: depth == 1 (first_encoder only) ---------------------------
    B3, D3 = 8, 128
    kx3, kp3 = jax.random.split(k3)
    w3, b3 = _make_params(kp3, [D3, D3])
    x3 = jax.random.normal(kx3, (B3, D3), dtype=jnp.float32)
    out3 = jax.block_until_ready(encoder_layer(x3, w3, b3, mxu_dtype=jnp.float32))
    ref3 = encoder_layer_ref(x3, w3, b3, mxu_dtype=jnp.float32)
    assert jnp.allclose(out3, ref3, atol=2e-5, rtol=2e-5), "depth=1 path mismatch"

    print("KERNEL_OK")
</pallas_src>

<mosaic_0001>
module attributes {stable_mosaic.version = 11 : i64} {
  func.func @kernel(%arg0: i32, %arg1: memref<512x128xf32, #tpu.memory_space<vmem>>, %arg2: memref<128x128xf32, #tpu.memory_space<vmem>>, %arg3: memref<1x128xf32, #tpu.memory_space<vmem>>, %arg4: memref<1x128x128xf32, #tpu.memory_space<vmem>>, %arg5: memref<1x1x128xf32, #tpu.memory_space<vmem>>, %arg6: memref<512x128xf32, #tpu.memory_space<vmem>>) attributes {dimension_semantics = [#tpu.dimension_semantics<parallel>], iteration_bounds = array<i64: 2>, scalar_prefetch = 0 : i64, scratch_operands = 0 : i64, tpu.core_type = #tpu.core_type<tc>, window_params = [{transform_indices = @transform_0, window_bounds = array<i64: 512, 128>}, {pipeline_mode = #tpu.pipeline_mode<synchronous>, transform_indices = @transform_1, window_bounds = array<i64: 128, 128>}, {pipeline_mode = #tpu.pipeline_mode<synchronous>, transform_indices = @transform_2, window_bounds = array<i64: 1, 128>}, {pipeline_mode = #tpu.pipeline_mode<synchronous>, transform_indices = @transform_3, window_bounds = array<i64: 1, 128, 128>}, {pipeline_mode = #tpu.pipeline_mode<synchronous>, transform_indices = @transform_4, window_bounds = array<i64: 1, 1, 128>}, {transform_indices = @transform_5, window_bounds = array<i64: 512, 128>}]} {
    %c0 = arith.constant 0 : index
    %c0_0 = arith.constant 0 : index
    %0 = vector.load %arg1[%c0, %c0_0] : memref<512x128xf32, #tpu.memory_space<vmem>>, vector<512x128xf32>
    %c0_1 = arith.constant 0 : index
    %c0_2 = arith.constant 0 : index
    %1 = vector.load %arg2[%c0_1, %c0_2] : memref<128x128xf32, #tpu.memory_space<vmem>>, vector<128x128xf32>
    %cst = arith.constant dense<0.000000e+00> : vector<512x128xf32>
    %2 = tpu.matmul %0, %1, %cst {dimension_numbers = #tpu.dot_dimension_numbers<[1], [0], [0], [1], [0, 0, 1, 1], [], []>} : vector<512x128xf32>, vector<128x128xf32>, vector<512x128xf32> -> vector<512x128xf32>
    %c0_3 = arith.constant 0 : index
    %c0_4 = arith.constant 0 : index
    %3 = vector.load %arg3[%c0_3, %c0_4] : memref<1x128xf32, #tpu.memory_space<vmem>>, vector<1x128xf32>
    %4 = vector.broadcast %3 : vector<1x128xf32> to vector<512x128xf32>
    %5 = arith.addf %2, %4 : vector<512x128xf32>
    %cst_5 = arith.constant 0.000000e+00 : f32
    %6 = vector.broadcast %cst_5 : f32 to vector<512x128xf32>
    %7 = arith.maximumf %5, %6 : vector<512x128xf32>
    %c0_6 = arith.constant 0 : index
    %c0_7 = arith.constant 0 : index
    %c0_8 = arith.constant 0 : index
    %8 = vector.load %arg4[%c0_6, %c0_7, %c0_8] : memref<1x128x128xf32, #tpu.memory_space<vmem>>, vector<1x128x128xf32>
    %9 = vector.shape_cast %8 : vector<1x128x128xf32> to vector<128x128xf32>
    %cst_9 = arith.constant dense<0.000000e+00> : vector<512x128xf32>
    %10 = tpu.matmul %7, %9, %cst_9 {dimension_numbers = #tpu.dot_dimension_numbers<[1], [0], [0], [1], [0, 0, 1, 1], [], []>} : vector<512x128xf32>, vector<128x128xf32>, vector<512x128xf32> -> vector<512x128xf32>
    %c0_10 = arith.constant 0 : index
    %c0_11 = arith.constant 0 : index
    %c0_12 = arith.constant 0 : index
    %11 = vector.load %arg5[%c0_10, %c0_11, %c0_12] : memref<1x1x128xf32, #tpu.memory_space<vmem>>, vector<1x1x128xf32>
    %12 = vector.shape_cast %11 : vector<1x1x128xf32> to vector<1x128xf32>
    %13 = vector.broadcast %12 : vector<1x128xf32> to vector<512x128xf32>
    %14 = arith.addf %10, %13 : vector<512x128xf32>
    %cst_13 = arith.constant 0.000000e+00 : f32
    %15 = vector.broadcast %cst_13 : f32 to vector<512x128xf32>
    %16 = arith.maximumf %14, %15 : vector<512x128xf32>
    %c0_14 = arith.constant 0 : index
    %c0_15 = arith.constant 0 : index
    %17 = vector.load %arg6[%c0_14, %c0_15] : memref<512x128xf32, #tpu.memory_space<vmem>>, vector<512x128xf32>
    tpu.vector_store %arg6[%c0_14, %c0_15], %16 {strides = array<i32>} : memref<512x128xf32, #tpu.memory_space<vmem>>, vector<512x128xf32>,
    return
  }
  func.func @transform_0(%arg0: i32) -> (i32, i32) {
    %c0_i32 = arith.constant 0 : i32
    %c0_i32_0 = arith.constant 0 : i32
    return %arg0, %c0_i32 : i32, i32
  }
  func.func @transform_1(%arg0: i32) -> (i32, i32) {
    %c0_i32 = arith.constant 0 : i32
    %c0_i32_0 = arith.constant 0 : i32
    %c0_i32_1 = arith.constant 0 : i32
    return %c0_i32, %c0_i32_0 : i32, i32
  }
  func.func @transform_2(%arg0: i32) -> (i32, i32) {
    %c0_i32 = arith.constant 0 : i32
    %c0_i32_0 = arith.constant 0 : i32
    %c0_i32_1 = arith.constant 0 : i32
    return %c0_i32, %c0_i32_0 : i32, i32
  }
  func.func @transform_3(%arg0: i32) -> (i32, i32, i32) {
    %c0_i32 = arith.constant 0 : i32
    %c0_i32_0 = arith.constant 0 : i32
    %c0_i32_1 = arith.constant 0 : i32
    %c0_i32_2 = arith.constant 0 : i32
    return %c0_i32, %c0_i32_0, %c0_i32_1 : i32, i32, i32
  }
  func.func @transform_4(%arg0: i32) -> (i32, i32, i32) {
    %c0_i32 = arith.constant 0 : i32
    %c0_i32_0 = arith.constant 0 : i32
    %c0_i32_1 = arith.constant 0 : i32
    %c0_i32_2 = arith.constant 0 : i32
    return %c0_i32, %c0_i32_0, %c0_i32_1 : i32, i32, i32
  }
  func.func @transform_5(%arg0: i32) -> (i32, i32) {
    %c0_i32 = arith.constant 0 : i32
    %c0_i32_0 = arith.constant 0 : i32
    return %arg0, %c0_i32 : i32, i32
  }
}

</mosaic_0001>

<bundles_post_ra>
// kernel: tpu_custom_call.1
= control target key start
LH: loop header
LB: loop body
LE: loop exit
PB: predicated region body
PF: predicated region fallthrough
CT: control target
= control target key end

     0   :  { %10 = vsyncpa [#allocation3], 0  ;;  %s2739_s0 = inlined_call_operand.hbm [shape: f32[1024,128], index: 0, kind: input, shape index: {}]   ;;  %s2740_s1 = inlined_call_operand.hbm [shape: f32[128,128], index: 1, kind: input, shape index: {}]   ;;  %s2741_s2 = inlined_call_operand.vmem [shape: f32[1,128], index: 2, kind: input, shape index: {}]   ;;  %s2742_s3 = inlined_call_operand.hbm [shape: f32[1,128,128], index: 3, kind: input, shape index: {}]   ;;  %s2743_s4 = inlined_call_operand.vmem [shape: f32[1,1,128], index: 4, kind: input, shape index: {}]   ;;  %s2744_s5 = inlined_call_operand.hbm [shape: f32[1024,128], index: 5, kind: output, shape index: {}]  }
   0x1   :  { %12 = vsyncpa [#allocation3 + $0x1], 0 }
   0x2   :  { %13 = vsyncpa [#allocation6], 0 }
   0x3   :  { %14 = vsyncpa [#allocation4], 0 }
   0x4   :  { %16 = vsyncpa [#allocation4 + $0x1], 0  ;;  %s2221_s18 = smov 0   ;;  %s2223_s19 = smov 0  }
   0x5   :  { %s2225_s20 = smov 0   ;;  %s2227_s21 = smov 0  }
   0x6 LB: > { %s2242_s22 = sadd.s32 4294967295, %s2181_s21   ;;  %s1452_s23 = sadd.s32 4294967294, %s2181_s21   ;;  %s2181_s21 = sphi %s2227_s21, %s2764_s21   ;;  %s2177_s20 = sphi %s2225_s20, %s2763_s20   ;;  %s2173_s19 = sphi %s2223_s19, %s2762_s19   ;;  %s2169_s18 = sphi %s2221_s18, %s2761_s18  }
   0x7   : > { %p42_p0 = scmp.ne.s32.totalorder %s2173_s19, %s2169_s18  ;;  %p2745_p1 = scmp.eq.s32.totalorder %s2242_s22, 0 }
   0x8   : > { %p156_p3 = scmp.eq.s32.totalorder %s1452_s23, 1  ;;  %p1453_p5 = scmp.ge.s32.totalorder %s2181_s21, 1 }
   0x9   : > { %p2251_p4 = por %p2745_p1, %p42_p0  ;;  %p163_p7 = scmp.lt.s32.totalorder %s2181_s21, 3 }
   0xa   : > { %p2256_p6 = por %p156_p3, %p42_p0  ;;  %s2183_s27 = smov [#allocation5]  }
   0xb   : > { %s2748_s24 = scalar_select %p2251_p4, 1, 0 }
   0xc   : > { %s2749_s25 = scalar_select %p2256_p6, 1, 0 }
   0xd   : > { %p2261_p8 = pnand %p1453_p5, %p163_p7  ;;  %s175_s28 = sshll.u32 %s2183_s27, 4  ;;  %s2265_s28 = int_to_ptr.vmem [resolvable:$true] %s175_s28 }
   0xe   : > { %s2184_s30 = smov [#allocation7]   ;;  %s2025_s9 = scalar_lea.hbm %s2740_s1, 2048 }
   0xf   : > { %p1966_p9 = pneg %p2261_p8  ;;  %s191_s6 = sshll.u32 %s2184_s30, 4  ;;  %s2276_s6 = int_to_ptr.vmem [resolvable:$true] %s191_s6 }
  0x10   : > { %p2026_p12 = scmp.ne.s32.totalorder %s2740_s1, %s2025_s9  ;;  %p2032_p5 = scmp.lt.u32.totalorder %s2025_s9, %s2740_s1 }
  0x11   : > { %p2272_p11 = pnand %p1966_p9, %p2745_p1 }
  0x13   : > { %p2027_p13 = pneg %p2272_p11 }
  0x15   : > { %p2028_p0 = pnand %p2027_p13, %p2026_p12 }
  0x17   : > { %p2029_p3 = pneg %p2028_p0 }
  0x19   : > { %p2034_p7 = pnand %p2032_p5, %p2029_p3 }
  0x1b   : > { %2037 = shalt.err (!%p2034_p7)
}
  0x1c   : > { %s2038_s14 = scalar_lea.vmem %s2265_s28, 2048  ;;  %p2046_p2 = scmp.lt.s32.totalorder %s2265_s28, %s2265_s28 }
  0x1d   : > { %p2039_p9 = scmp.ne.s32.totalorder %s2265_s28, %s2038_s14  ;;  %p2047_p12 = scmp.lt.s32.totalorder %s2038_s14, %s2038_s14 }
  0x1f   : > { %p2041_p10 = pnand %p2039_p9, %p2027_p13  ;;  %p2048_p0 = por %p2047_p12, %p2046_p2 }
  0x21   : > { %p2042_p1 = pneg %p2041_p10 }
  0x23   : > { %p2049_p6 = pnand %p2048_p0, %p2042_p1 }
  0x25   : > { %2052 = shalt.err (!%p2049_p6)
}
  0x26   : > { %s2185_s15 = smov 128   ;;  %s2186_s16 = smov 8  }
  0x27   : > { %1969 = dma.hbm_to_vmem [thread:$0]  (!%p2272_p11), %s2740_s1, 2048, %s2265_s28, [#allocation6], %s2185_s15, %s2185_s15, %s2186_s16  }
  0x28   : > { %s2053_s7 = scalar_lea.hbm %s2742_s3, 2048 }
  0x29   : > { %p2054_p1 = scmp.ne.s32.totalorder %s2742_s3, %s2053_s7  ;;  %p2060_p10 = scmp.lt.u32.totalorder %s2053_s7, %s2742_s3 }
  0x2b   : > { %p2056_p2 = pnand %p2054_p1, %p2027_p13 }
  0x2d   : > { %p2057_p6 = pneg %p2056_p2 }
  0x2f   : > { %p2062_p3 = pnand %p2060_p10, %p2057_p6 }
  0x31   : > { %2065 = shalt.err (!%p2062_p3)
}
  0x32   : > { %s2066_s28 = scalar_lea.vmem %s2276_s6, 2048  ;;  %p2074_p12 = scmp.lt.s32.totalorder %s2276_s6, %s2276_s6 }
  0x33   : > { %p2067_p5 = scmp.ne.s32.totalorder %s2276_s6, %s2066_s28  ;;  %p2075_p0 = scmp.lt.s32.totalorder %s2066_s28, %s2066_s28 }
  0x35   : > { %p2069_p7 = pnand %p2067_p5, %p2027_p13  ;;  %p2076_p1 = por %p2075_p0, %p2074_p12 }
  0x37   : > { %p2070_p9 = pneg %p2069_p7 }
  0x39   : > { %p2077_p2 = pnand %p2076_p1, %p2070_p9 }
  0x3b   : > { %2080 = shalt.err (!%p2077_p2)
}
  0x3c   : > { %1972 = dma.hbm_to_vmem [thread:$0]  (!%p2272_p11), %s2742_s3, 2048, %s2276_s6, [#allocation6], %s2185_s15, %s2185_s15, %s2186_s16  }
  0x3d   : > { %s2337_s29 = sadd.s32 1, %s2181_s21   ;;  %s29_s14 = sadd.s32 1, %s2177_s20 }
  0x3e   : > { %s26_s17 = ssub.s32 %s2181_s21, %s2337_s29  ;;  %p36_p13 = scmp.ne.s32.totalorder %s2177_s20, %s2173_s19 }
  0x3f   : > { %p27_p6 = scmp.eq.s32.totalorder %s26_s17, 0  ;;  %p37_p10 = scmp.eq.s32.totalorder %s2181_s21, 0 }
  0x40   : > { %p2752_p3 = scmp.eq.s32.totalorder %s2242_s22, 1  ;;  %p1983_p7 = scmp.lt.s32.totalorder %s2181_s21, 2 }
  0x41   : > { %s2353_s27 = scalar_select %p27_p6, %s2177_s20, %s29_s14  }
  0x42   : > { %p2347_p5 = por %p2752_p3, %p36_p13  ;;  %p38_p9 = por %p37_p10, %p36_p13 }
  0x43   : > { %s208_s30 = sand.u32 1, %s2177_s20   ;;  %s1472_s6 = sshll.u32 %s2181_s21, 13 }
  0x44   : > { %s2753_s23 = scalar_select %p2347_p5, 1, 0 }
  0x45   : > { %s1457_s7 = sshll.u32 %s208_s30, 9  ;;  %s2360_s10 = scalar_lea.hbm %s2739_s0, %s1472_s6 }
  0x46   : > { %s212_s11 = scalar_lea.vmem [#allocation2], %s1457_s7  ;;  %p2364_p11 = pnand %p1983_p7, %p38_p9 }
  0x47   : > { %s219_s28 = sshll.u32 %s212_s11, 4  ;;  %s2368_s13 = scalar_lea.sflag [#allocation3], %s208_s30  ;;  %s2362_s28 = int_to_ptr.vmem [resolvable:$true] %s219_s28 }
  0x48   : > { %s2081_s14 = scalar_lea.hbm %s2360_s10, 8192  ;;  %p2083_p0 = pneg %p2364_p11 }
  0x49   : > { %p2082_p12 = scmp.ne.s32.totalorder %s2360_s10, %s2081_s14  ;;  %s2086_s6 = scalar_lea.hbm %s2739_s0, 16384 }
  0x4a   : > { %p2087_p13 = scmp.lt.u32.totalorder %s2360_s10, %s2739_s0  ;;  %p2088_p6 = scmp.lt.u32.totalorder %s2086_s6, %s2081_s14 }
  0x4b   : > { %p2084_p1 = pnand %p2083_p0, %p2082_p12  ;;  %p2090_p3 = scmp.lt.u32.totalorder %s2081_s14, %s2360_s10 }
  0x4c   : > { %p2089_p10 = por %p2088_p6, %p2087_p13 }
  0x4d   : > { %p2085_p2 = pneg %p2084_p1 }
  0x4e   : > { %p2091_p7 = por %p2090_p3, %p2089_p10 }
  0x50   : > { %p2092_p9 = pnand %p2091_p7, %p2085_p2 }
  0x52   : > { %2095 = shalt.err (!%p2092_p9)
}
  0x53   : > { %s2096_s30 = scalar_lea.vmem %s2362_s28, 8192  ;;  %s2187_s11 = smov [#allocation2]  }
  0x54   : > { %p2097_p12 = scmp.ne.s32.totalorder %s2362_s28, %s2096_s30  ;;  %s2101_s17 = sshll.u32 %s2187_s11, 4  ;;  %s2102_s17 = int_to_ptr.vmem [resolvable:$false] %s2101_s17 }
  0x55   : > { %s2103_s7 = scalar_lea.vmem %s2102_s17, 16384  ;;  %p2104_p4 = scmp.lt.s32.totalorder %s2362_s28, %s2102_s17 }
  0x56   : > { %p2099_p1 = pnand %p2097_p12, %p2083_p0  ;;  %p2105_p13 = scmp.lt.s32.totalorder %s2103_s7, %s2096_s30 }
  0x58   : > { %p2100_p5 = pneg %p2099_p1  ;;  %p2106_p6 = por %p2105_p13, %p2104_p4 }
  0x5a   : > { %p2107_p10 = pnand %p2106_p6, %p2100_p5 }
  0x5c   : > { %2110 = shalt.err (!%p2107_p10)
}
  0x5d   : > { %1976 = dma.hbm_to_vmem [thread:$0]  (!%p2364_p11), %s2360_s10, 8192, %s2362_s28, %s2368_s13, %s2185_s15, %s2185_s15, %s2186_s16  }
  0x5e   : > { %231 = sbr.rel (%p2261_p8) target bundleno = 714 (0x2ca), region = 40  ;;  %s2402_s14 = sand.u32 (!%p2261_p8), 1, %s2173_s19  }
  0x5f   : > { %s1461_s6 = sshll.u32 (!%p2261_p8), %s2402_s14, 9  ;;  %s234_s8 = scalar_lea.sflag (!%p2261_p8), [#allocation3], %s2402_s14 }
  0x60   : > { %s2408_s12 = scalar_lea.vmem (!%p2261_p8), [#allocation2], %s1461_s6  ;;  %p2755_p4 = scmp.ne.s32.totalorder (!%p2261_p8), %s2748_s24, 0 }
  0x65   : > { %2156 = dma.done.wait (%p2755_p4), %s234_s8, 8192  }
  0x66   : > { %2158 = vsyncadd (%p2755_p4), %s234_s8, 4294959104  ;;  %p2756_p5 = scmp.eq.s32.totalorder %s2242_s22, 0 }
  0x68   : > { %2160 = dma.done.wait (%p2756_p5), [#allocation6], 4096   ;;  %p2757_p8 = pmov %p2756_p5 }
  0x69   : > { %v338_v0 = vld [vmem:[#allocation5] sm:$0xff]  ;;  %v339_v1 = vld [vmem:[#allocation5 + $0x8] sm:$0xff]  ;;  %v340_v2 = vld [vmem:[#allocation5 + $0x10] sm:$0xff]  ;;  %s2560_s10 = scalar_lea.vmem [#allocation8], %s1461_s6  ;;  %s1473_s28 = sshll.u32 %s2242_s22, 13 }
  0x6a   : > { %2162 = vsyncadd (%p2757_p8), [#allocation6], 4294963200  ;;  %v1890_v3 = vpack.c.bf16 %v339_v1, %v338_v0  ;;  %v341_v4 = vld [vmem:[#allocation5 + $0x18] sm:$0xff]  ;;  %v342_v6 = vld [vmem:[#allocation5 + $0x20] sm:$0xff]  ;;  %s1360_s13 = sshll.u32 %s2560_s10, 4  ;;  %s2691_s11 = scalar_lea.hbm %s2744_s5, %s1473_s28  ;;  %s2693_s13 = int_to_ptr.vmem [resolvable:$true] %s1360_s13 }
  0x6b   : > { %v1894_v5 = vpack.c.bf16 %v341_v4, %v340_v2  ;;  %v343_v7 = vld [vmem:[#allocation5 + $0x28] sm:$0xff]  ;;  %v274_v9 = vld [vmem:[%s2408_s12] sm:$0xff]  ;;  %v344_v10 = vld [vmem:[#allocation5 + $0x30] sm:$0xff]  ;;  %s1347_s22 = scalar_lea.sflag [#allocation4], %s2402_s14  ;;  %s2111_s17 = scalar_lea.vmem %s2693_s13, 8192 }
  0x6c   : > { %1891 = vmatprep.subr.bf16.mxu0 %v1890_v3  ;;  %v1898_v8 = vpack.c.bf16 %v343_v7, %v342_v6  ;;  %v345_v11 = vld [vmem:[#allocation5 + $0x38] sm:$0xff]  ;;  %1666 = vmatprep.mubr.f32.mxu0 %v274_v9  ;;  %v346_v13 = vld [vmem:[#allocation5 + $0x40] sm:$0xff]  ;;  %v347_v14 = vld [vmem:[#allocation5 + $0x48] sm:$0xff]  ;;  %p2112_p11 = scmp.ne.s32.totalorder %s2693_s13, %s2111_s17  ;;  %p2758_p0 = scmp.ne.s32.totalorder %s2753_s23, 0 }
  0x6d   : > { %1893 = vmatpush3.bf16.msra.mxu0 %v1890_v3  ;;  %v1902_v12 = vpack.c.bf16 %v345_v11, %v344_v10  ;;  %v1906_v15 = vpack.c.bf16 %v347_v14, %v346_v13  ;;  %v348_v16 = vld [vmem:[#allocation5 + $0x50] sm:$0xff]  ;;  %v349_v17 = vld [vmem:[#allocation5 + $0x58] sm:$0xff]  ;;  %v350_v19 = vld [vmem:[#allocation5 + $0x60] sm:$0xff]  ;;  %s2188_s7 = smov [#allocation8]  }
  0x6e   : > { %1895 = vmatprep.subr.bf16.mxu0 %v1894_v5  ;;  %v1910_v18 = vpack.c.bf16 %v349_v17, %v348_v16  ;;  %v351_v20 = vld [vmem:[#allocation5 + $0x68] sm:$0xff]  ;;  %v352_v22 = vld [vmem:[#allocation5 + $0x70] sm:$0xff]  ;;  %v353_v23 = vld [vmem:[#allocation5 + $0x78] sm:$0xff]  ;;  %p2113_p2 = pnand %p2112_p11, %p2758_p0  ;;  %s2115_s6 = sshll.u32 %s2188_s7, 4  ;;  %s2116_s6 = int_to_ptr.vmem [resolvable:$false] %s2115_s6 }
  0x6f   : > { %v1914_v21 = vpack.c.bf16 %v351_v20, %v350_v19  ;;  %v1918_v24 = vpack.c.bf16 %v353_v23, %v352_v22  ;;  %v810_v25 = vld [vmem:[#allocation7] sm:$0xff]  ;;  %v811_v26 = vld [vmem:[#allocation7 + $0x8] sm:$0xff]  ;;  %v812_v27 = vld [vmem:[#allocation7 + $0x10] sm:$0xff]  ;;  %s2117_s8 = scalar_lea.vmem %s2116_s6, 16384  ;;  %p2118_p7 = scmp.lt.s32.totalorder %s2693_s13, %s2116_s6 }
  0x70   : > { %v275_v28 = vld [vmem:[%s2408_s12 + $0x8] sm:$0xff]  ;;  %v1922_v29 = vpack.c.bf16 %v811_v26, %v810_v25  ;;  %v813_v30 = vld [vmem:[#allocation7 + $0x18] sm:$0xff]  ;;  %v276_v31 = vld [vmem:[%s2408_s12 + $0x10] sm:$0xff]  ;;  %p2114_p3 = pneg %p2113_p2  ;;  %p2119_p9 = scmp.lt.s32.totalorder %s2117_s8, %s2111_s17 }
  0x71   : > { %1897 = vmatpush3.bf16.msra.mxu0 %v1894_v5  ;;  %v1926_v32 = vpack.c.bf16 %v813_v30, %v812_v27  ;;  %v814_v33 = vld [vmem:[#allocation7 + $0x20] sm:$0xff]  ;;  %v815_v34 = vld [vmem:[#allocation7 + $0x28] sm:$0xff]  ;;  %v277_v35 = vld [vmem:[%s2408_s12 + $0x18] sm:$0xff] }
  0x72   : > { %1899 = vmatprep.subr.bf16.mxu0 %v1898_v8  ;;  %1923 = vmatprep.subr.bf16.mxu1 %v1922_v29  ;;  %v1930_v36 = vpack.c.bf16 %v815_v34, %v814_v33  ;;  %v278_v37 = vld [vmem:[%s2408_s12 + $0x20] sm:$0xff]  ;;  %v816_v38 = vld [vmem:[#allocation7 + $0x30] sm:$0xff]  ;;  %v817_v39 = vld [vmem:[#allocation7 + $0x38] sm:$0xff]  ;;  %p2120_p12 = por %p2119_p9, %p2118_p7 }
  0x73   : > { %1925 = vmatpush3.bf16.msra.mxu1 %v1922_v29  ;;  %v279_v40 = vld [vmem:[%s2408_s12 + $0x28] sm:$0xff]  ;;  %v1934_v41 = vpack.c.bf16 %v817_v39, %v816_v38  ;;  %v280_v42 = vld [vmem:[%s2408_s12 + $0x30] sm:$0xff]  ;;  %v818_v43 = vld [vmem:[#allocation7 + $0x40] sm:$0xff] }
  0x74   : > { %1927 = vmatprep.subr.bf16.mxu1 %v1926_v32  ;;  %v819_v44 = vld [vmem:[#allocation7 + $0x48] sm:$0xff]  ;;  %v281_v45 = vld [vmem:[%s2408_s12 + $0x38] sm:$0xff]  ;;  %v282_v47 = vld [vmem:[%s2408_s12 + $0x40] sm:$0xff]  ;;  %p2121_p1 = pnand %p2120_p12, %p2114_p3 }
  0x75   : > { %1901 = vmatpush3.bf16.msra.mxu0 %v1898_v8  ;;  %v1938_v46 = vpack.c.bf16 %v819_v44, %v818_v43  ;;  %v820_v48 = vld [vmem:[#allocation7 + $0x50] sm:$0xff]  ;;  %v821_v49 = vld [vmem:[#allocation7 + $0x58] sm:$0xff]  ;;  %v283_v50 = vld [vmem:[%s2408_s12 + $0x48] sm:$0xff] }
  0x76   : > { %1903 = vmatprep.subr.bf16.mxu0 %v1902_v12  ;;  %v1942_v51 = vpack.c.bf16 %v821_v49, %v820_v48  ;;  %v284_v52 = vld [vmem:[%s2408_s12 + $0x50] sm:$0xff]  ;;  %v822_v53 = vld [vmem:[#allocation7 + $0x60] sm:$0xff]  ;;  %v823_v54 = vld [vmem:[#allocation7 + $0x68] sm:$0xff] }
  0x77   : > { %1929 = vmatpush3.bf16.msra.mxu1 %v1926_v32  ;;  %v285_v55 = vld [vmem:[%s2408_s12 + $0x58] sm:$0xff]  ;;  %v1946_v56 = vpack.c.bf16 %v823_v54, %v822_v53  ;;  %v286_v57 = vld [vmem:[%s2408_s12 + $0x60] sm:$0xff]  ;;  %v287_v58 = vld [vmem:[%s2408_s12 + $0x68] sm:$0xff] }
  0x78   : > { %1931 = vmatprep.subr.bf16.mxu1 %v1930_v36  ;;  %v288_v59 = vld [vmem:[%s2408_s12 + $0x70] sm:$0xff]  ;;  %v289_v60 = vld [vmem:[%s2408_s12 + $0x78] sm:$0xff]  ;;  %v290_v61 = vld [vmem:[%s2408_s12 + $0x80] sm:$0xff] }
  0x79   : > { %1905 = vmatpush3.bf16.msra.mxu0 %v1902_v12  ;;  %v291_v62 = vld [vmem:[%s2408_s12 + $0x88] sm:$0xff]  ;;  %v292_v63 = vld [vmem:[%s2408_s12 + $0x90] sm:$0xff]  ;;  %v293_v0 = vld [vmem:[%s2408_s12 + $0x98] sm:$0xff] }
  0x7a   : > { %1907 = vmatprep.subr.bf16.mxu0 %v1906_v15  ;;  %v294_v1 = vld [vmem:[%s2408_s12 + $0xa0] sm:$0xff]  ;;  %v295_v2 = vld [vmem:[%s2408_s12 + $0xa8] sm:$0xff]  ;;  %v296_v3 = vld [vmem:[%s2408_s12 + $0xb0] sm:$0xff] }
  0x7b   : > { %1933 = vmatpush3.bf16.msra.mxu1 %v1930_v36  ;;  %v297_v4 = vld [vmem:[%s2408_s12 + $0xb8] sm:$0xff]  ;;  %v298_v5 = vld [vmem:[%s2408_s12 + $0xc0] sm:$0xff]  ;;  %v299_v6 = vld [vmem:[%s2408_s12 + $0xc8] sm:$0xff] }
  0x7c   : > { %1935 = vmatprep.subr.bf16.mxu1 %v1934_v41  ;;  %v300_v7 = vld [vmem:[%s2408_s12 + $0xd0] sm:$0xff]  ;;  %v301_v8 = vld [vmem:[%s2408_s12 + $0xd8] sm:$0xff]  ;;  %v302_v9 = vld [vmem:[%s2408_s12 + $0xe0] sm:$0xff] }
  0x7d   : > { %1909 = vmatpush3.bf16.msra.mxu0 %v1906_v15  ;;  %v303_v10 = vld [vmem:[%s2408_s12 + $0xe8] sm:$0xff]  ;;  %v304_v11 = vld [vmem:[%s2408_s12 + $0xf0] sm:$0xff]  ;;  %v305_v12 = vld [vmem:[%s2408_s12 + $0xf8] sm:$0xff] }
  0x7e   : > { %1911 = vmatprep.subr.bf16.mxu0 %v1910_v18  ;;  %v306_v13 = vld [vmem:[%s2408_s12 + $0x100] sm:$0xff]  ;;  %v307_v14 = vld [vmem:[%s2408_s12 + $0x108] sm:$0xff]  ;;  %v308_v15 = vld [vmem:[%s2408_s12 + $0x110] sm:$0xff] }
  0x7f   : > { %1937 = vmatpush3.bf16.msra.mxu1 %v1934_v41  ;;  %v309_v16 = vld [vmem:[%s2408_s12 + $0x118] sm:$0xff]  ;;  %v310_v17 = vld [vmem:[%s2408_s12 + $0x120] sm:$0xff]  ;;  %v312_v19 = vld [vmem:[%s2408_s12 + $0x130] sm:$0xff] }
  0x80   : > { %1939 = vmatprep.subr.bf16.mxu1 %v1938_v46  ;;  %v313_v20 = vld [vmem:[%s2408_s12 + $0x138] sm:$0xff]  ;;  %v315_v22 = vld [vmem:[%s2408_s12 + $0x148] sm:$0xff]  ;;  %v316_v23 = vld [vmem:[%s2408_s12 + $0x150] sm:$0xff] }
  0x81   : > { %1913 = vmatpush3.bf16.msra.mxu0 %v1910_v18  ;;  %v311_v18 = vld [vmem:[%s2408_s12 + $0x128] sm:$0xff]  ;;  %v318_v25 = vld [vmem:[%s2408_s12 + $0x160] sm:$0xff]  ;;  %v824_v26 = vld [vmem:[#allocation7 + $0x70] sm:$0xff] }
  0x82   : > { %1915 = vmatprep.subr.bf16.mxu0 %v1914_v21  ;;  %v825_v27 = vld [vmem:[#allocation7 + $0x78] sm:$0xff]  ;;  %v319_v29 = vld [vmem:[%s2408_s12 + $0x168] sm:$0xff]  ;;  %v320_v30 = vld [vmem:[%s2408_s12 + $0x170] sm:$0xff] }
  0x83   : > { %1941 = vmatpush3.bf16.msra.mxu1 %v1938_v46  ;;  %v322_v32 = vld [vmem:[%s2408_s12 + $0x180] sm:$0xff]  ;;  %v323_v33 = vld [vmem:[%s2408_s12 + $0x188] sm:$0xff]  ;;  %v324_v34 = vld [vmem:[%s2408_s12 + $0x190] sm:$0xff] }
  0x84   : > { %1943 = vmatprep.subr.bf16.mxu1 %v1942_v51  ;;  %v326_v36 = vld [vmem:[%s2408_s12 + $0x1a0] sm:$0xff]  ;;  %v328_v38 = vld [vmem:[%s2408_s12 + $0x1b0] sm:$0xff]  ;;  %v329_v39 = vld [vmem:[%s2408_s12 + $0x1b8] sm:$0xff] }
  0x85   : > { %1917 = vmatpush3.bf16.msra.mxu0 %v1914_v21  ;;  %v314_v21 = vld [vmem:[%s2408_s12 + $0x140] sm:$0xff]  ;;  %v331_v41 = vld [vmem:[%s2408_s12 + $0x1c8] sm:$0xff]  ;;  %v333_v43 = vld [vmem:[%s2408_s12 + $0x1d8] sm:$0xff] }
  0x86   : > { %1919 = vmatprep.subr.bf16.mxu0 %v1918_v24  ;;  %v334_v44 = vld [vmem:[%s2408_s12 + $0x1e0] sm:$0xff]  ;;  %v336_v46 = vld [vmem:[%s2408_s12 + $0x1f0] sm:$0xff] }
  0x87   : > { %1945 = vmatpush3.bf16.msra.mxu1 %v1942_v51  ;;  %v2485_v48 = vld [vmem:[%s2741_s2] ss:$0 sm:$0xff] }
  0x88   : > { %1947 = vmatprep.subr.bf16.mxu1 %v1946_v56 }
  0x89   : > { %1921 = vmatpush3.bf16.msra.mxu0 %v1918_v24  ;;  %v317_v24 = vld [vmem:[%s2408_s12 + $0x158] sm:$0xff] }
  0x8b   : > { %1949 = vmatpush3.bf16.msra.mxu1 %v1946_v56 }
  0x8c   : > { %1667 = vmatmul.mubr.f32.vlgmr.msra.gmra.mrb[0].mxu0 %v275_v28  ;;  %v1950_v28 = vpack.c.bf16 %v825_v27, %v824_v26 }
  0x8d   : > { %1669 = vmatprep.mubr.f32.mxu0 %v276_v31  ;;  %v321_v31 = vld [vmem:[%s2408_s12 + $0x178] sm:$0xff] }
  0x8e   : > { %1951 = vmatprep.subr.bf16.mxu1 %v1950_v28 }
  0x8f   : > { %1953 = vmatpush3.bf16.msra.mxu1 %v1950_v28 }
  0x90   : > { %1670 = vmatmul.mubr.f32.gmra.mrb[2].mxu0 %v277_v35  ;;  %v325_v35 = vld [vmem:[%s2408_s12 + $0x198] sm:$0xff] }
  0x91   : > { %1672 = vmatprep.mubr.f32.mxu0 %v278_v37  ;;  %v327_v37 = vld [vmem:[%s2408_s12 + $0x1a8] sm:$0xff] }
  0x94   : > { %1673 = vmatmul.mubr.f32.gmra.mrb[4].mxu0 %v279_v40  ;;  %v330_v40 = vld [vmem:[%s2408_s12 + $0x1c0] sm:$0xff] }
  0x95   : > { %1675 = vmatprep.mubr.f32.mxu0 %v280_v42  ;;  %v332_v42 = vld [vmem:[%s2408_s12 + $0x1d0] sm:$0xff] }
  0x98   : > { %1676 = vmatmul.mubr.f32.gmra.mrb[6].mxu0 %v281_v45  ;;  %v335_v45 = vld [vmem:[%s2408_s12 + $0x1e8] sm:$0xff] }
  0x99   : > { %1678 = vmatprep.mubr.f32.mxu0 %v282_v47  ;;  %v337_v47 = vld [vmem:[%s2408_s12 + $0x1f8] sm:$0xff] }
  0x9c   : > { %1679 = vmatmul.mubr.f32.gmra.mrb[8].mxu0 %v283_v50 }
  0x9d   : > { %1681 = vmatprep.mubr.f32.mxu0 %v284_v52 }
  0xa0   : > { %1682 = vmatmul.mubr.f32.gmra.mrb[10].mxu0 %v285_v55 }
  0xa1   : > { %1684 = vmatprep.mubr.f32.mxu0 %v286_v57 }
  0xa4   : > { %1685 = vmatmul.mubr.f32.gmra.mrb[12].mxu0 %v287_v58 }
  0xa5   : > { %1687 = vmatprep.mubr.f32.mxu0 %v288_v59 }
  0xa8   : > { %1688 = vmatmul.mubr.f32.gmra.mrb[14].mxu0 %v289_v60 }
  0xa9   : > { %1690 = vmatprep.mubr.f32.mxu0 %v290_v61 }
  0xac   : > { %1691 = vmatmul.mubr.f32.gmra.mrb[16].mxu0 %v291_v62 }
  0xad   : > { %1693 = vmatprep.mubr.f32.mxu0 %v292_v63 }
  0xb0   : > { %1694 = vmatmul.mubr.f32.gmra.mrb[18].mxu0 %v293_v0 }
  0xb1   : > { %1696 = vmatprep.mubr.f32.mxu0 %v294_v1 }
  0xb4   : > { %1697 = vmatmul.mubr.f32.gmra.mrb[20].mxu0 %v295_v2 }
  0xb5   : > { %1699 = vmatprep.mubr.f32.mxu0 %v296_v3 }
  0xb8   : > { %1700 = vmatmul.mubr.f32.gmra.mrb[22].mxu0 %v297_v4 }
  0xb9   : > { %1702 = vmatprep.mubr.f32.mxu0 %v298_v5 }
  0xbc   : > { %1703 = vmatmul.mubr.f32.gmra.mrb[24].mxu0 %v299_v6 }
  0xbd   : > { %1705 = vmatprep.mubr.f32.mxu0 %v300_v7 }
  0xc0   : > { %1706 = vmatmul.mubr.f32.gmra.mrb[26].mxu0 %v301_v8 }
  0xc1   : > { %1708 = vmatprep.mubr.f32.mxu0 %v302_v9 }
  0xc4   : > { %1709 = vmatmul.mubr.f32.gmra.mrb[28].mxu0 %v303_v10 }
  0xc5   : > { %1711 = vmatprep.mubr.f32.mxu0 %v304_v11 }
  0xc8   : > { %1712 = vmatmul.mubr.f32.gmra.mrb[30].mxu0 %v305_v12 }
  0xc9   : > { %1714 = vmatprep.mubr.f32.mxu0 %v306_v13 }
  0xcc   : > { %1715 = vmatmul.mubr.f32.gmra.mrb[32].mxu0 %v307_v14 }
  0xcd   : > { %1717 = vmatprep.mubr.f32.mxu0 %v308_v15 }
  0xd0   : > { %1718 = vmatmul.mubr.f32.gmra.mrb[34].mxu0 %v309_v16 }
  0xd1   : > { %1720 = vmatprep.mubr.f32.mxu0 %v310_v17 }
  0xd4   : > { %1721 = vmatmul.mubr.f32.gmra.mrb[36].mxu0 %v311_v18 }
  0xd5   : > { %1723 = vmatprep.mubr.f32.mxu0 %v312_v19 }
  0xd8   : > { %1724 = vmatmul.mubr.f32.gmra.mrb[38].mxu0 %v313_v20 }
  0xd9   : > { %1726 = vmatprep.mubr.f32.mxu0 %v314_v21 }
  0xdc   : > { %1727 = vmatmul.mubr.f32.gmra.mrb[40].mxu0 %v315_v22 }
  0xdd   : > { %1729 = vmatprep.mubr.f32.mxu0 %v316_v23 }
  0xe0   : > { %1730 = vmatmul.mubr.f32.gmra.mrb[42].mxu0 %v317_v24 }
  0xe1   : > { %1732 = vmatprep.mubr.f32.mxu0 %v318_v25 }
  0xe4   : > { %1733 = vmatmul.mubr.f32.gmra.mrb[44].mxu0 %v319_v29 }
  0xe5   : > { %1735 = vmatprep.mubr.f32.mxu0 %v320_v30 }
  0xe8   : > { %1736 = vmatmul.mubr.f32.gmra.mrb[46].mxu0 %v321_v31 }
  0xe9   : > { %1738 = vmatprep.mubr.f32.mxu0 %v322_v32 }
  0xec   : > { %1739 = vmatmul.mubr.f32.gmra.mrb[48].mxu0 %v323_v33 }
  0xed   : > { %1741 = vmatprep.mubr.f32.mxu0 %v324_v34 }
  0xf0   : > { %1742 = vmatmul.mubr.f32.gmra.mrb[50].mxu0 %v325_v35 }
  0xf1   : > { %1744 = vmatprep.mubr.f32.mxu0 %v326_v36 }
  0xf4   : > { %1745 = vmatmul.mubr.f32.gmra.mrb[52].mxu0 %v327_v37 }
  0xf5   : > { %1747 = vmatprep.mubr.f32.mxu0 %v328_v38 }
  0xf8   : > { %1748 = vmatmul.mubr.f32.gmra.mrb[54].mxu0 %v329_v39 }
  0xf9   : > { %1750 = vmatprep.mubr.f32.mxu0 %v330_v40 }
  0xfc   : > { %1751 = vmatmul.mubr.f32.gmra.mrb[56].mxu0 %v331_v41 }
  0xfd   : > { %1753 = vmatprep.mubr.f32.mxu0 %v332_v42 }
 0x100   : > { %1754 = vmatmul.mubr.f32.gmra.mrb[58].mxu0 %v333_v43 }
 0x101   : > { %1756 = vmatprep.mubr.f32.mxu0 %v334_v44 }
 0x104   : > { %1757 = vmatmul.mubr.f32.gmra.mrb[60].mxu0 %v335_v45 }
 0x105   : > { %1759 = vmatprep.mubr.f32.mxu0 %v336_v46 }
 0x108   : > { %1760 = vmatmul.mubr.f32.gmra.mrb[62].mxu0 %v337_v47 }
 0x15f   : > { %v1668_v49 = vpop.f32.mrb[0].mxu0 }
 0x160   : > { %v433_v50 = vadd.f32 %v1668_v49, %v2485_v48  ;;  %v427_v51 = vpop.f32.mrb[1].mxu0 }
 0x161   : > { %v428_v52 = vadd.f32 %v2485_v48, %v427_v51 }
 0x162   : > { %v747_v55 = vmax.f32 %v433_v50, 0.0 }
 0x163   : > { %v1671_v53 = vpop.f32.mrb[2].mxu0  ;;  %v746_v54 = vmax.f32 %v428_v52, 0.0 }
 0x164   : > { %v443_v56 = vadd.f32 %v1671_v53, %v2485_v48  ;;  %v437_v57 = vpop.f32.mrb[3].mxu0 }
 0x165   : > { %v438_v58 = vadd.f32 %v2485_v48, %v437_v57  ;;  %1794 = vmatprep.mubr.f32.mxu1 %v746_v54 }
 0x166   : > { %1795 = vmatmul.mubr.f32.vlgmr.msra.gmra.mrb[0].mxu1 %v747_v55  ;;  %v749_v61 = vmax.f32 %v443_v56, 0.0 }
 0x167   : > { %v748_v59 = vmax.f32 %v438_v58, 0.0  ;;  %v1674_v60 = vpop.f32.mrb[4].mxu0 }
 0x168   : > { %v453_v62 = vadd.f32 %v1674_v60, %v2485_v48  ;;  %v447_v63 = vpop.f32.mrb[5].mxu0 }
 0x169   : > { %v448_v0 = vadd.f32 %v2485_v48, %v447_v63  ;;  %1797 = vmatprep.mubr.f32.mxu1 %v748_v59 }
 0x16a   : > { %1798 = vmatmul.mubr.f32.gmra.mrb[2].mxu1 %v749_v61  ;;  %v751_v3 = vmax.f32 %v453_v62, 0.0 }
 0x16b   : > { %v750_v1 = vmax.f32 %v448_v0, 0.0  ;;  %v1677_v2 = vpop.f32.mrb[6].mxu0 }
 0x16c   : > { %v463_v4 = vadd.f32 %v1677_v2, %v2485_v48  ;;  %v457_v5 = vpop.f32.mrb[7].mxu0 }
 0x16d   : > { %v458_v6 = vadd.f32 %v2485_v48, %v457_v5  ;;  %1800 = vmatprep.mubr.f32.mxu1 %v750_v1 }
 0x16e   : > { %1801 = vmatmul.mubr.f32.gmra.mrb[4].mxu1 %v751_v3  ;;  %v753_v9 = vmax.f32 %v463_v4, 0.0 }
 0x16f   : > { %v752_v7 = vmax.f32 %v458_v6, 0.0  ;;  %v1680_v8 = vpop.f32.mrb[8].mxu0 }
 0x170   : > { %v473_v10 = vadd.f32 %v1680_v8, %v2485_v48  ;;  %v467_v11 = vpop.f32.mrb[9].mxu0 }
 0x171   : > { %v468_v12 = vadd.f32 %v2485_v48, %v467_v11  ;;  %1803 = vmatprep.mubr.f32.mxu1 %v752_v7 }
 0x172   : > { %1804 = vmatmul.mubr.f32.gmra.mrb[6].mxu1 %v753_v9  ;;  %v755_v15 = vmax.f32 %v473_v10, 0.0 }
 0x173   : > { %v754_v13 = vmax.f32 %v468_v12, 0.0  ;;  %v1683_v14 = vpop.f32.mrb[10].mxu0 }
 0x174   : > { %v483_v16 = vadd.f32 %v1683_v14, %v2485_v48  ;;  %v477_v17 = vpop.f32.mrb[11].mxu0 }
 0x175   : > { %v478_v18 = vadd.f32 %v2485_v48, %v477_v17  ;;  %1806 = vmatprep.mubr.f32.mxu1 %v754_v13 }
 0x176   : > { %1807 = vmatmul.mubr.f32.gmra.mrb[8].mxu1 %v755_v15  ;;  %v757_v21 = vmax.f32 %v483_v16, 0.0 }
 0x177   : > { %v756_v19 = vmax.f32 %v478_v18, 0.0  ;;  %v1686_v20 = vpop.f32.mrb[12].mxu0 }
 0x178   : > { %v493_v22 = vadd.f32 %v1686_v20, %v2485_v48  ;;  %v487_v23 = vpop.f32.mrb[13].mxu0 }
 0x179   : > { %v488_v24 = vadd.f32 %v2485_v48, %v487_v23  ;;  %1809 = vmatprep.mubr.f32.mxu1 %v756_v19 }
 0x17a   : > { %1810 = vmatmul.mubr.f32.gmra.mrb[10].mxu1 %v757_v21  ;;  %v759_v27 = vmax.f32 %v493_v22, 0.0 }
 0x17b   : > { %v758_v25 = vmax.f32 %v488_v24, 0.0  ;;  %v1689_v26 = vpop.f32.mrb[14].mxu0 }
 0x17c   : > { %v503_v28 = vadd.f32 %v1689_v26, %v2485_v48  ;;  %v497_v29 = vpop.f32.mrb[15].mxu0 }
 0x17d   : > { %v498_v30 = vadd.f32 %v2485_v48, %v497_v29  ;;  %1812 = vmatprep.mubr.f32.mxu1 %v758_v25 }
 0x17e   : > { %1813 = vmatmul.mubr.f32.gmra.mrb[12].mxu1 %v759_v27  ;;  %v761_v33 = vmax.f32 %v503_v28, 0.0 }
 0x17f   : > { %v760_v31 = vmax.f32 %v498_v30, 0.0  ;;  %v1692_v32 = vpop.f32.mrb[16].mxu0 }
 0x180   : > { %v513_v34 = vadd.f32 %v1692_v32, %v2485_v48  ;;  %v507_v35 = vpop.f32.mrb[17].mxu0 }
 0x181   : > { %v508_v36 = vadd.f32 %v2485_v48, %v507_v35  ;;  %1815 = vmatprep.mubr.f32.mxu1 %v760_v31 }
 0x182   : > { %1816 = vmatmul.mubr.f32.gmra.mrb[14].mxu1 %v761_v33  ;;  %v763_v39 = vmax.f32 %v513_v34, 0.0 }
 0x183   : > { %v762_v37 = vmax.f32 %v508_v36, 0.0  ;;  %v1695_v38 = vpop.f32.mrb[18].mxu0 }
 0x184   : > { %v523_v40 = vadd.f32 %v1695_v38, %v2485_v48  ;;  %v517_v41 = vpop.f32.mrb[19].mxu0 }
 0x185   : > { %v518_v42 = vadd.f32 %v2485_v48, %v517_v41  ;;  %1818 = vmatprep.mubr.f32.mxu1 %v762_v37 }
 0x186   : > { %1819 = vmatmul.mubr.f32.gmra.mrb[16].mxu1 %v763_v39  ;;  %v765_v45 = vmax.f32 %v523_v40, 0.0 }
 0x187   : > { %v764_v43 = vmax.f32 %v518_v42, 0.0  ;;  %v1698_v44 = vpop.f32.mrb[20].mxu0 }
 0x188   : > { %v533_v46 = vadd.f32 %v1698_v44, %v2485_v48  ;;  %v527_v47 = vpop.f32.mrb[21].mxu0 }
 0x189   : > { %v528_v49 = vadd.f32 %v2485_v48, %v527_v47  ;;  %1821 = vmatprep.mubr.f32.mxu1 %v764_v43 }
 0x18a   : > { %1822 = vmatmul.mubr.f32.gmra.mrb[18].mxu1 %v765_v45  ;;  %v767_v52 = vmax.f32 %v533_v46, 0.0 }
 0x18b   : > { %v766_v50 = vmax.f32 %v528_v49, 0.0  ;;  %v1701_v51 = vpop.f32.mrb[22].mxu0 }
 0x18c   : > { %v543_v53 = vadd.f32 %v1701_v51, %v2485_v48  ;;  %v537_v54 = vpop.f32.mrb[23].mxu0 }
 0x18d   : > { %v538_v55 = vadd.f32 %v2485_v48, %v537_v54  ;;  %1824 = vmatprep.mubr.f32.mxu1 %v766_v50 }
 0x18e   : > { %1825 = vmatmul.mubr.f32.gmra.mrb[20].mxu1 %v767_v52  ;;  %v769_v58 = vmax.f32 %v543_v53, 0.0 }
 0x18f   : > { %v768_v56 = vmax.f32 %v538_v55, 0.0  ;;  %v1704_v57 = vpop.f32.mrb[24].mxu0 }
 0x190   : > { %v553_v59 = vadd.f32 %v1704_v57, %v2485_v48  ;;  %v547_v60 = vpop.f32.mrb[25].mxu0 }
 0x191   : > { %v548_v61 = vadd.f32 %v2485_v48, %v547_v60  ;;  %1827 = vmatprep.mubr.f32.mxu1 %v768_v56 }
 0x192   : > { %1828 = vmatmul.mubr.f32.gmra.mrb[22].mxu1 %v769_v58  ;;  %v771_v0 = vmax.f32 %v553_v59, 0.0 }
 0x193   : > { %v770_v62 = vmax.f32 %v548_v61, 0.0  ;;  %v1707_v63 = vpop.f32.mrb[26].mxu0 }
 0x194   : > { %v563_v1 = vadd.f32 %v1707_v63, %v2485_v48  ;;  %v557_v2 = vpop.f32.mrb[27].mxu0 }
 0x195   : > { %v558_v3 = vadd.f32 %v2485_v48, %v557_v2  ;;  %1830 = vmatprep.mubr.f32.mxu1 %v770_v62 }
 0x196   : > { %1831 = vmatmul.mubr.f32.gmra.mrb[24].mxu1 %v771_v0  ;;  %v773_v6 = vmax.f32 %v563_v1, 0.0 }
 0x197   : > { %v772_v4 = vmax.f32 %v558_v3, 0.0  ;;  %v1710_v5 = vpop.f32.mrb[28].mxu0 }
 0x198   : > { %v573_v7 = vadd.f32 %v1710_v5, %v2485_v48  ;;  %v567_v8 = vpop.f32.mrb[29].mxu0 }
 0x199   : > { %v568_v9 = vadd.f32 %v2485_v48, %v567_v8  ;;  %1833 = vmatprep.mubr.f32.mxu1 %v772_v4 }
 0x19a   : > { %1834 = vmatmul.mubr.f32.gmra.mrb[26].mxu1 %v773_v6  ;;  %v775_v12 = vmax.f32 %v573_v7, 0.0 }
 0x19b   : > { %v774_v10 = vmax.f32 %v568_v9, 0.0  ;;  %v1713_v11 = vpop.f32.mrb[30].mxu0 }
 0x19c   : > { %v583_v13 = vadd.f32 %v1713_v11, %v2485_v48  ;;  %v577_v14 = vpop.f32.mrb[31].mxu0 }
 0x19d   : > { %v578_v15 = vadd.f32 %v2485_v48, %v577_v14  ;;  %1836 = vmatprep.mubr.f32.mxu1 %v774_v10 }
 0x19e   : > { %1837 = vmatmul.mubr.f32.gmra.mrb[28].mxu1 %v775_v12  ;;  %v777_v18 = vmax.f32 %v583_v13, 0.0 }
 0x19f   : > { %v776_v16 = vmax.f32 %v578_v15, 0.0  ;;  %v1716_v17 = vpop.f32.mrb[32].mxu0 }
 0x1a0   : > { %v593_v19 = vadd.f32 %v1716_v17, %v2485_v48  ;;  %v587_v20 = vpop.f32.mrb[33].mxu0 }
 0x1a1   : > { %v588_v21 = vadd.f32 %v2485_v48, %v587_v20  ;;  %1839 = vmatprep.mubr.f32.mxu1 %v776_v16 }
 0x1a2   : > { %1840 = vmatmul.mubr.f32.gmra.mrb[30].mxu1 %v777_v18  ;;  %v779_v24 = vmax.f32 %v593_v19, 0.0 }
 0x1a3   : > { %v778_v22 = vmax.f32 %v588_v21, 0.0  ;;  %v1719_v23 = vpop.f32.mrb[34].mxu0 }
 0x1a4   : > { %v603_v25 = vadd.f32 %v1719_v23, %v2485_v48  ;;  %v597_v26 = vpop.f32.mrb[35].mxu0 }
 0x1a5   : > { %v598_v27 = vadd.f32 %v2485_v48, %v597_v26  ;;  %1842 = vmatprep.mubr.f32.mxu1 %v778_v22 }
 0x1a6   : > { %1843 = vmatmul.mubr.f32.gmra.mrb[32].mxu1 %v779_v24  ;;  %v781_v30 = vmax.f32 %v603_v25, 0.0 }
 0x1a7   : > { %v780_v28 = vmax.f32 %v598_v27, 0.0  ;;  %v1722_v29 = vpop.f32.mrb[36].mxu0 }
 0x1a8   : > { %v613_v31 = vadd.f32 %v1722_v29, %v2485_v48  ;;  %v607_v32 = vpop.f32.mrb[37].mxu0 }
 0x1a9   : > { %v608_v33 = vadd.f32 %v2485_v48, %v607_v32  ;;  %1845 = vmatprep.mubr.f32.mxu1 %v780_v28 }
 0x1aa   : > { %1846 = vmatmul.mubr.f32.gmra.mrb[34].mxu1 %v781_v30  ;;  %v783_v36 = vmax.f32 %v613_v31, 0.0 }
 0x1ab   : > { %v782_v34 = vmax.f32 %v608_v33, 0.0  ;;  %v1725_v35 = vpop.f32.mrb[38].mxu0 }
 0x1ac   : > { %v623_v37 = vadd.f32 %v1725_v35, %v2485_v48  ;;  %v617_v38 = vpop.f32.mrb[39].mxu0 }
 0x1ad   : > { %v618_v39 = vadd.f32 %v2485_v48, %v617_v38  ;;  %1848 = vmatprep.mubr.f32.mxu1 %v782_v34 }
 0x1ae   : > { %1849 = vmatmul.mubr.f32.gmra.mrb[36].mxu1 %v783_v36  ;;  %v785_v42 = vmax.f32 %v623_v37, 0.0 }
 0x1af   : > { %v784_v40 = vmax.f32 %v618_v39, 0.0  ;;  %v1728_v41 = vpop.f32.mrb[40].mxu0 }
 0x1b0   : > { %v633_v43 = vadd.f32 %v1728_v41, %v2485_v48  ;;  %v627_v44 = vpop.f32.mrb[41].mxu0 }
 0x1b1   : > { %v628_v45 = vadd.f32 %v2485_v48, %v627_v44  ;;  %1851 = vmatprep.mubr.f32.mxu1 %v784_v40 }
 0x1b2   : > { %1852 = vmatmul.mubr.f32.gmra.mrb[38].mxu1 %v785_v42  ;;  %v787_v49 = vmax.f32 %v633_v43, 0.0 }
 0x1b3   : > { %v786_v46 = vmax.f32 %v628_v45, 0.0  ;;  %v1731_v47 = vpop.f32.mrb[42].mxu0 }
 0x1b4   : > { %v643_v50 = vadd.f32 %v1731_v47, %v2485_v48  ;;  %v637_v51 = vpop.f32.mrb[43].mxu0 }
 0x1b5   : > { %v638_v52 = vadd.f32 %v2485_v48, %v637_v51  ;;  %1854 = vmatprep.mubr.f32.mxu1 %v786_v46 }
 0x1b6   : > { %1855 = vmatmul.mubr.f32.gmra.mrb[40].mxu1 %v787_v49  ;;  %v789_v55 = vmax.f32 %v643_v50, 0.0 }
 0x1b7   : > { %v788_v53 = vmax.f32 %v638_v52, 0.0  ;;  %v1734_v54 = vpop.f32.mrb[44].mxu0  ;;  %v2554_v52 = vld [vmem:[%s2743_s4] ss:$0 sm:$0xff] }
 0x1b8   : > { %v653_v56 = vadd.f32 %v1734_v54, %v2485_v48  ;;  %v647_v57 = vpop.f32.mrb[45].mxu0 }
 0x1b9   : > { %v648_v58 = vadd.f32 %v2485_v48, %v647_v57  ;;  %1857 = vmatprep.mubr.f32.mxu1 %v788_v53 }
 0x1ba   : > { %1858 = vmatmul.mubr.f32.gmra.mrb[42].mxu1 %v789_v55  ;;  %v791_v61 = vmax.f32 %v653_v56, 0.0 }
 0x1bb   : > { %v790_v59 = vmax.f32 %v648_v58, 0.0  ;;  %v1737_v60 = vpop.f32.mrb[46].mxu0 }
 0x1bc   : > { %v663_v62 = vadd.f32 %v1737_v60, %v2485_v48  ;;  %v657_v63 = vpop.f32.mrb[47].mxu0 }
 0x1bd   : > { %v658_v0 = vadd.f32 %v2485_v48, %v657_v63  ;;  %1860 = vmatprep.mubr.f32.mxu1 %v790_v59 }
 0x1be   : > { %1861 = vmatmul.mubr.f32.gmra.mrb[44].mxu1 %v791_v61  ;;  %v793_v3 = vmax.f32 %v663_v62, 0.0 }
 0x1bf   : > { %v792_v1 = vmax.f32 %v658_v0, 0.0  ;;  %v1740_v2 = vpop.f32.mrb[48].mxu0 }
 0x1c0   : > { %v673_v4 = vadd.f32 %v1740_v2, %v2485_v48  ;;  %v667_v5 = vpop.f32.mrb[49].mxu0 }
 0x1c1   : > { %v668_v6 = vadd.f32 %v2485_v48, %v667_v5  ;;  %1863 = vmatprep.mubr.f32.mxu1 %v792_v1 }
 0x1c2   : > { %1864 = vmatmul.mubr.f32.gmra.mrb[46].mxu1 %v793_v3  ;;  %v795_v9 = vmax.f32 %v673_v4, 0.0 }
 0x1c3   : > { %v794_v7 = vmax.f32 %v668_v6, 0.0  ;;  %v1743_v8 = vpop.f32.mrb[50].mxu0 }
 0x1c4   : > { %v683_v10 = vadd.f32 %v1743_v8, %v2485_v48  ;;  %v677_v11 = vpop.f32.mrb[51].mxu0 }
 0x1c5   : > { %v678_v12 = vadd.f32 %v2485_v48, %v677_v11  ;;  %1866 = vmatprep.mubr.f32.mxu1 %v794_v7 }
 0x1c6   : > { %1867 = vmatmul.mubr.f32.gmra.mrb[48].mxu1 %v795_v9  ;;  %v797_v15 = vmax.f32 %v683_v10, 0.0 }
 0x1c7   : > { %v796_v13 = vmax.f32 %v678_v12, 0.0  ;;  %v1746_v14 = vpop.f32.mrb[52].mxu0 }
 0x1c8   : > { %v693_v16 = vadd.f32 %v1746_v14, %v2485_v48  ;;  %v687_v17 = vpop.f32.mrb[53].mxu0 }
 0x1c9   : > { %v688_v18 = vadd.f32 %v2485_v48, %v687_v17  ;;  %1869 = vmatprep.mubr.f32.mxu1 %v796_v13 }
 0x1ca   : > { %1870 = vmatmul.mubr.f32.gmra.mrb[50].mxu1 %v797_v15  ;;  %v799_v21 = vmax.f32 %v693_v16, 0.0 }
 0x1cb   : > { %v798_v19 = vmax.f32 %v688_v18, 0.0  ;;  %v1749_v20 = vpop.f32.mrb[54].mxu0 }
 0x1cc   : > { %v703_v22 = vadd.f32 %v1749_v20, %v2485_v48  ;;  %v697_v23 = vpop.f32.mrb[55].mxu0 }
 0x1cd   : > { %v698_v24 = vadd.f32 %v2485_v48, %v697_v23  ;;  %1872 = vmatprep.mubr.f32.mxu1 %v798_v19 }
 0x1ce   : > { %1873 = vmatmul.mubr.f32.gmra.mrb[52].mxu1 %v799_v21  ;;  %v801_v27 = vmax.f32 %v703_v22, 0.0 }
 0x1cf   : > { %v800_v25 = vmax.f32 %v698_v24, 0.0  ;;  %v1752_v26 = vpop.f32.mrb[56].mxu0 }
 0x1d0   : > { %v713_v28 = vadd.f32 %v1752_v26, %v2485_v48  ;;  %v707_v29 = vpop.f32.mrb[57].mxu0 }
 0x1d1   : > { %v708_v30 = vadd.f32 %v2485_v48, %v707_v29  ;;  %1875 = vmatprep.mubr.f32.mxu1 %v800_v25 }
 0x1d2   : > { %1876 = vmatmul.mubr.f32.gmra.mrb[54].mxu1 %v801_v27  ;;  %v803_v33 = vmax.f32 %v713_v28, 0.0 }
 0x1d3   : > { %v802_v31 = vmax.f32 %v708_v30, 0.0  ;;  %v1755_v32 = vpop.f32.mrb[58].mxu0 }
 0x1d4   : > { %v723_v34 = vadd.f32 %v1755_v32, %v2485_v48  ;;  %v717_v35 = vpop.f32.mrb[59].mxu0 }
 0x1d5   : > { %v718_v36 = vadd.f32 %v2485_v48, %v717_v35  ;;  %1878 = vmatprep.mubr.f32.mxu1 %v802_v31 }
 0x1d6   : > { %1879 = vmatmul.mubr.f32.gmra.mrb[56].mxu1 %v803_v33  ;;  %v805_v39 = vmax.f32 %v723_v34, 0.0 }
 0x1d7   : > { %v804_v37 = vmax.f32 %v718_v36, 0.0  ;;  %v1758_v38 = vpop.f32.mrb[60].mxu0 }
 0x1d8   : > { %v733_v40 = vadd.f32 %v1758_v38, %v2485_v48  ;;  %v727_v41 = vpop.f32.mrb[61].mxu0 }
 0x1d9   : > { %v728_v42 = vadd.f32 %v2485_v48, %v727_v41  ;;  %1881 = vmatprep.mubr.f32.mxu1 %v804_v37 }
 0x1da   : > { %1882 = vmatmul.mubr.f32.gmra.mrb[58].mxu1 %v805_v39  ;;  %v807_v45 = vmax.f32 %v733_v40, 0.0 }
 0x1db   : > { %v806_v43 = vmax.f32 %v728_v42, 0.0  ;;  %v1761_v44 = vpop.f32.mrb[62].mxu0 }
 0x1dc   : > { %v743_v46 = vadd.f32 %v1761_v44, %v2485_v48  ;;  %v737_v47 = vpop.f32.mrb[63].mxu0 }
 0x1dd   : > { %v738_v49 = vadd.f32 %v2485_v48, %v737_v47  ;;  %1884 = vmatprep.mubr.f32.mxu1 %v806_v43 }
 0x1de   : > { %1885 = vmatmul.mubr.f32.gmra.mrb[60].mxu1 %v807_v45  ;;  %v809_v51 = vmax.f32 %v743_v46, 0.0 }
 0x1df   : > { %v808_v50 = vmax.f32 %v738_v49, 0.0 }
 0x1e1   : > { %1887 = vmatprep.mubr.f32.mxu1 %v808_v50 }
 0x1e2   : > { %1888 = vmatmul.mubr.f32.gmra.mrb[62].mxu1 %v809_v51 }
 0x239   : > { %v1796_v53 = vpop.f32.mrb[0].mxu1 }
 0x23a   : > { %v905_v54 = vadd.f32 %v1796_v53, %v2554_v52  ;;  %v899_v55 = vpop.f32.mrb[1].mxu1 }
 0x23b   : > { %v900_v56 = vadd.f32 %v2554_v52, %v899_v55 }
 0x23c   : > { %v1219_v57 = vmax.f32 %v905_v54, 0.0 }
 0x23d   : > { %v1218_v58 = vmax.f32 %v900_v56, 0.0  ;;  %v1799_v48 = vpop.f32.mrb[2].mxu1 }
 0x23e   : > { %1283 = vst [vmem:[%s2560_s10 + $0x8] sm:$0xff] %v1219_v57  ;;  %v915_v59 = vadd.f32 %v1799_v48, %v2554_v52  ;;  %v909_v60 = vpop.f32.mrb[3].mxu1 }
 0x23f   : > { %1282 = vst [vmem:[%s2560_s10] sm:$0xff] %v1218_v58  ;;  %v910_v61 = vadd.f32 %v2554_v52, %v909_v60 }
 0x240   : > { %v1221_v62 = vmax.f32 %v915_v59, 0.0 }
 0x241   : > { %v1220_v63 = vmax.f32 %v910_v61, 0.0  ;;  %v1802_v0 = vpop.f32.mrb[4].mxu1 }
 0x242   : > { %1285 = vst [vmem:[%s2560_s10 + $0x18] sm:$0xff] %v1221_v62  ;;  %v925_v1 = vadd.f32 %v1802_v0, %v2554_v52  ;;  %v919_v2 = vpop.f32.mrb[5].mxu1 }
 0x243   : > { %1284 = vst [vmem:[%s2560_s10 + $0x10] sm:$0xff] %v1220_v63  ;;  %v920_v3 = vadd.f32 %v2554_v52, %v919_v2 }
 0x244   : > { %v1223_v4 = vmax.f32 %v925_v1, 0.0 }
 0x245   : > { %v1222_v5 = vmax.f32 %v920_v3, 0.0  ;;  %v1805_v6 = vpop.f32.mrb[6].mxu1 }
 0x246   : > { %1287 = vst [vmem:[%s2560_s10 + $0x28] sm:$0xff] %v1223_v4  ;;  %v935_v7 = vadd.f32 %v1805_v6, %v2554_v52  ;;  %v929_v8 = vpop.f32.mrb[7].mxu1 }
 0x247   : > { %1286 = vst [vmem:[%s2560_s10 + $0x20] sm:$0xff] %v1222_v5  ;;  %v930_v9 = vadd.f32 %v2554_v52, %v929_v8 }
 0x248   : > { %v1225_v10 = vmax.f32 %v935_v7, 0.0 }
 0x249   : > { %v1224_v11 = vmax.f32 %v930_v9, 0.0  ;;  %v1808_v12 = vpop.f32.mrb[8].mxu1 }
 0x24a   : > { %1289 = vst [vmem:[%s2560_s10 + $0x38] sm:$0xff] %v1225_v10  ;;  %v945_v13 = vadd.f32 %v1808_v12, %v2554_v52  ;;  %v939_v14 = vpop.f32.mrb[9].mxu1 }
 0x24b   : > { %1288 = vst [vmem:[%s2560_s10 + $0x30] sm:$0xff] %v1224_v11  ;;  %v940_v15 = vadd.f32 %v2554_v52, %v939_v14 }
 0x24c   : > { %v1227_v16 = vmax.f32 %v945_v13, 0.0 }
 0x24d   : > { %v1226_v17 = vmax.f32 %v940_v15, 0.0  ;;  %v1811_v18 = vpop.f32.mrb[10].mxu1 }
 0x24e   : > { %1291 = vst [vmem:[%s2560_s10 + $0x48] sm:$0xff] %v1227_v16  ;;  %v955_v19 = vadd.f32 %v1811_v18, %v2554_v52  ;;  %v949_v20 = vpop.f32.mrb[11].mxu1 }
 0x24f   : > { %1290 = vst [vmem:[%s2560_s10 + $0x40] sm:$0xff] %v1226_v17  ;;  %v950_v21 = vadd.f32 %v2554_v52, %v949_v20 }
 0x250   : > { %v1229_v22 = vmax.f32 %v955_v19, 0.0 }
 0x251   : > { %v1228_v23 = vmax.f32 %v950_v21, 0.0  ;;  %v1814_v24 = vpop.f32.mrb[12].mxu1 }
 0x252   : > { %1293 = vst [vmem:[%s2560_s10 + $0x58] sm:$0xff] %v1229_v22  ;;  %v965_v25 = vadd.f32 %v1814_v24, %v2554_v52  ;;  %v959_v26 = vpop.f32.mrb[13].mxu1 }
 0x253   : > { %1292 = vst [vmem:[%s2560_s10 + $0x50] sm:$0xff] %v1228_v23  ;;  %v960_v27 = vadd.f32 %v2554_v52, %v959_v26 }
 0x254   : > { %v1231_v28 = vmax.f32 %v965_v25, 0.0 }
 0x255   : > { %v1230_v29 = vmax.f32 %v960_v27, 0.0  ;;  %v1817_v30 = vpop.f32.mrb[14].mxu1 }
 0x256   : > { %1295 = vst [vmem:[%s2560_s10 + $0x68] sm:$0xff] %v1231_v28  ;;  %v975_v31 = vadd.f32 %v1817_v30, %v2554_v52  ;;  %v969_v32 = vpop.f32.mrb[15].mxu1 }
 0x257   : > { %1294 = vst [vmem:[%s2560_s10 + $0x60] sm:$0xff] %v1230_v29  ;;  %v970_v33 = vadd.f32 %v2554_v52, %v969_v32 }
 0x258   : > { %v1233_v34 = vmax.f32 %v975_v31, 0.0 }
 0x259   : > { %v1232_v35 = vmax.f32 %v970_v33, 0.0  ;;  %v1820_v36 = vpop.f32.mrb[16].mxu1 }
 0x25a   : > { %1297 = vst [vmem:[%s2560_s10 + $0x78] sm:$0xff] %v1233_v34  ;;  %v985_v37 = vadd.f32 %v1820_v36, %v2554_v52  ;;  %v979_v38 = vpop.f32.mrb[17].mxu1 }
 0x25b   : > { %1296 = vst [vmem:[%s2560_s10 + $0x70] sm:$0xff] %v1232_v35  ;;  %v980_v39 = vadd.f32 %v2554_v52, %v979_v38 }
 0x25c   : > { %v1235_v40 = vmax.f32 %v985_v37, 0.0 }
 0x25d   : > { %v1234_v41 = vmax.f32 %v980_v39, 0.0  ;;  %v1823_v42 = vpop.f32.mrb[18].mxu1 }
 0x25e   : > { %1299 = vst [vmem:[%s2560_s10 + $0x88] sm:$0xff] %v1235_v40  ;;  %v995_v43 = vadd.f32 %v1823_v42, %v2554_v52  ;;  %v989_v44 = vpop.f32.mrb[19].mxu1 }
 0x25f   : > { %1298 = vst [vmem:[%s2560_s10 + $0x80] sm:$0xff] %v1234_v41  ;;  %v990_v45 = vadd.f32 %v2554_v52, %v989_v44 }
 0x260   : > { %v1237_v46 = vmax.f32 %v995_v43, 0.0 }
 0x261   : > { %v1236_v47 = vmax.f32 %v990_v45, 0.0  ;;  %v1826_v49 = vpop.f32.mrb[20].mxu1 }
 0x262   : > { %1301 = vst [vmem:[%s2560_s10 + $0x98] sm:$0xff] %v1237_v46  ;;  %v1005_v50 = vadd.f32 %v1826_v49, %v2554_v52  ;;  %v999_v51 = vpop.f32.mrb[21].mxu1 }
 0x263   : > { %1300 = vst [vmem:[%s2560_s10 + $0x90] sm:$0xff] %v1236_v47  ;;  %v1000_v53 = vadd.f32 %v2554_v52, %v999_v51 }
 0x264   : > { %v1239_v54 = vmax.f32 %v1005_v50, 0.0 }
 0x265   : > { %v1238_v55 = vmax.f32 %v1000_v53, 0.0  ;;  %v1829_v56 = vpop.f32.mrb[22].mxu1 }
 0x266   : > { %1303 = vst [vmem:[%s2560_s10 + $0xa8] sm:$0xff] %v1239_v54  ;;  %v1015_v57 = vadd.f32 %v1829_v56, %v2554_v52  ;;  %v1009_v58 = vpop.f32.mrb[23].mxu1 }
 0x267   : > { %1302 = vst [vmem:[%s2560_s10 + $0xa0] sm:$0xff] %v1238_v55  ;;  %v1010_v48 = vadd.f32 %v2554_v52, %v1009_v58 }
 0x268   : > { %v1241_v59 = vmax.f32 %v1015_v57, 0.0 }
 0x269   : > { %v1240_v60 = vmax.f32 %v1010_v48, 0.0  ;;  %v1832_v61 = vpop.f32.mrb[24].mxu1 }
 0x26a   : > { %1305 = vst [vmem:[%s2560_s10 + $0xb8] sm:$0xff] %v1241_v59  ;;  %v1025_v62 = vadd.f32 %v1832_v61, %v2554_v52  ;;  %v1019_v63 = vpop.f32.mrb[25].mxu1 }
 0x26b   : > { %1304 = vst [vmem:[%s2560_s10 + $0xb0] sm:$0xff] %v1240_v60  ;;  %v1020_v0 = vadd.f32 %v2554_v52, %v1019_v63 }
 0x26c   : > { %v1243_v1 = vmax.f32 %v1025_v62, 0.0 }
 0x26d   : > { %v1242_v2 = vmax.f32 %v1020_v0, 0.0  ;;  %v1835_v3 = vpop.f32.mrb[26].mxu1 }
 0x26e   : > { %1307 = vst [vmem:[%s2560_s10 + $0xc8] sm:$0xff] %v1243_v1  ;;  %v1035_v4 = vadd.f32 %v1835_v3, %v2554_v52  ;;  %v1029_v5 = vpop.f32.mrb[27].mxu1 }
 0x26f   : > { %1306 = vst [vmem:[%s2560_s10 + $0xc0] sm:$0xff] %v1242_v2  ;;  %v1030_v6 = vadd.f32 %v2554_v52, %v1029_v5 }
 0x270   : > { %v1245_v7 = vmax.f32 %v1035_v4, 0.0 }
 0x271   : > { %v1244_v8 = vmax.f32 %v1030_v6, 0.0  ;;  %v1838_v9 = vpop.f32.mrb[28].mxu1 }
 0x272   : > { %1309 = vst [vmem:[%s2560_s10 + $0xd8] sm:$0xff] %v1245_v7  ;;  %v1045_v10 = vadd.f32 %v1838_v9, %v2554_v52  ;;  %v1039_v11 = vpop.f32.mrb[29].mxu1 }
 0x273   : > { %1308 = vst [vmem:[%s2560_s10 + $0xd0] sm:$0xff] %v1244_v8  ;;  %v1040_v12 = vadd.f32 %v2554_v52, %v1039_v11 }
 0x274   : > { %v1247_v13 = vmax.f32 %v1045_v10, 0.0 }
 0x275   : > { %v1246_v14 = vmax.f32 %v1040_v12, 0.0  ;;  %v1841_v15 = vpop.f32.mrb[30].mxu1 }
 0x276   : > { %1311 = vst [vmem:[%s2560_s10 + $0xe8] sm:$0xff] %v1247_v13  ;;  %v1055_v16 = vadd.f32 %v1841_v15, %v2554_v52  ;;  %v1049_v17 = vpop.f32.mrb[31].mxu1 }
 0x277   : > { %1310 = vst [vmem:[%s2560_s10 + $0xe0] sm:$0xff] %v1246_v14  ;;  %v1050_v18 = vadd.f32 %v2554_v52, %v1049_v17 }
 0x278   : > { %v1249_v19 = vmax.f32 %v1055_v16, 0.0 }
 0x279   : > { %v1248_v20 = vmax.f32 %v1050_v18, 0.0  ;;  %v1844_v21 = vpop.f32.mrb[32].mxu1 }
 0x27a   : > { %1313 = vst [vmem:[%s2560_s10 + $0xf8] sm:$0xff] %v1249_v19  ;;  %v1065_v22 = vadd.f32 %v1844_v21, %v2554_v52  ;;  %v1059_v23 = vpop.f32.mrb[33].mxu1 }
 0x27b   : > { %1312 = vst [vmem:[%s2560_s10 + $0xf0] sm:$0xff] %v1248_v20  ;;  %v1060_v24 = vadd.f32 %v2554_v52, %v1059_v23 }
 0x27c   : > { %v1251_v25 = vmax.f32 %v1065_v22, 0.0 }
 0x27d   : > { %v1250_v26 = vmax.f32 %v1060_v24, 0.0  ;;  %v1847_v27 = vpop.f32.mrb[34].mxu1 }
 0x27e   : > { %1315 = vst [vmem:[%s2560_s10 + $0x108] sm:$0xff] %v1251_v25  ;;  %v1075_v28 = vadd.f32 %v1847_v27, %v2554_v52  ;;  %v1069_v29 = vpop.f32.mrb[35].mxu1 }
 0x27f   : > { %1314 = vst [vmem:[%s2560_s10 + $0x100] sm:$0xff] %v1250_v26  ;;  %v1070_v30 = vadd.f32 %v2554_v52, %v1069_v29 }
 0x280   : > { %v1253_v31 = vmax.f32 %v1075_v28, 0.0 }
 0x281   : > { %v1252_v32 = vmax.f32 %v1070_v30, 0.0  ;;  %v1850_v33 = vpop.f32.mrb[36].mxu1 }
 0x282   : > { %1317 = vst [vmem:[%s2560_s10 + $0x118] sm:$0xff] %v1253_v31  ;;  %v1085_v34 = vadd.f32 %v1850_v33, %v2554_v52  ;;  %v1079_v35 = vpop.f32.mrb[37].mxu1 }
 0x283   : > { %1316 = vst [vmem:[%s2560_s10 + $0x110] sm:$0xff] %v1252_v32  ;;  %v1080_v36 = vadd.f32 %v2554_v52, %v1079_v35 }
 0x284   : > { %v1255_v37 = vmax.f32 %v1085_v34, 0.0 }
 0x285   : > { %v1254_v38 = vmax.f32 %v1080_v36, 0.0  ;;  %v1853_v39 = vpop.f32.mrb[38].mxu1 }
 0x286   : > { %1319 = vst [vmem:[%s2560_s10 + $0x128] sm:$0xff] %v1255_v37  ;;  %v1095_v40 = vadd.f32 %v1853_v39, %v2554_v52  ;;  %v1089_v41 = vpop.f32.mrb[39].mxu1 }
 0x287   : > { %1318 = vst [vmem:[%s2560_s10 + $0x120] sm:$0xff] %v1254_v38  ;;  %v1090_v42 = vadd.f32 %v2554_v52, %v1089_v41 }
 0x288   : > { %v1257_v43 = vmax.f32 %v1095_v40, 0.0 }
 0x289   : > { %v1256_v44 = vmax.f32 %v1090_v42, 0.0  ;;  %v1856_v45 = vpop.f32.mrb[40].mxu1 }
 0x28a   : > { %1321 = vst [vmem:[%s2560_s10 + $0x138] sm:$0xff] %v1257_v43  ;;  %v1105_v46 = vadd.f32 %v1856_v45, %v2554_v52  ;;  %v1099_v47 = vpop.f32.mrb[41].mxu1 }
 0x28b   : > { %1320 = vst [vmem:[%s2560_s10 + $0x130] sm:$0xff] %v1256_v44  ;;  %v1100_v49 = vadd.f32 %v2554_v52, %v1099_v47 }
 0x28c   : > { %v1259_v50 = vmax.f32 %v1105_v46, 0.0 }
 0x28d   : > { %v1258_v51 = vmax.f32 %v1100_v49, 0.0  ;;  %v1859_v53 = vpop.f32.mrb[42].mxu1 }
 0x28e   : > { %1323 = vst [vmem:[%s2560_s10 + $0x148] sm:$0xff] %v1259_v50  ;;  %v1115_v54 = vadd.f32 %v1859_v53, %v2554_v52  ;;  %v1109_v55 = vpop.f32.mrb[43].mxu1 }
 0x28f   : > { %1322 = vst [vmem:[%s2560_s10 + $0x140] sm:$0xff] %v1258_v51  ;;  %v1110_v56 = vadd.f32 %v2554_v52, %v1109_v55 }
 0x290   : > { %v1261_v57 = vmax.f32 %v1115_v54, 0.0 }
 0x291   : > { %v1260_v58 = vmax.f32 %v1110_v56, 0.0  ;;  %v1862_v48 = vpop.f32.mrb[44].mxu1 }
 0x292   : > { %1325 = vst [vmem:[%s2560_s10 + $0x158] sm:$0xff] %v1261_v57  ;;  %v1125_v59 = vadd.f32 %v1862_v48, %v2554_v52  ;;  %v1119_v60 = vpop.f32.mrb[45].mxu1 }
 0x293   : > { %1324 = vst [vmem:[%s2560_s10 + $0x150] sm:$0xff] %v1260_v58  ;;  %v1120_v61 = vadd.f32 %v2554_v52, %v1119_v60 }
 0x294   : > { %v1263_v62 = vmax.f32 %v1125_v59, 0.0 }
 0x295   : > { %v1262_v63 = vmax.f32 %v1120_v61, 0.0  ;;  %v1865_v0 = vpop.f32.mrb[46].mxu1 }
 0x296   : > { %1327 = vst [vmem:[%s2560_s10 + $0x168] sm:$0xff] %v1263_v62  ;;  %v1135_v1 = vadd.f32 %v1865_v0, %v2554_v52  ;;  %v1129_v2 = vpop.f32.mrb[47].mxu1 }
 0x297   : > { %1326 = vst [vmem:[%s2560_s10 + $0x160] sm:$0xff] %v1262_v63  ;;  %v1130_v3 = vadd.f32 %v2554_v52, %v1129_v2 }
 0x298   : > { %v1265_v4 = vmax.f32 %v1135_v1, 0.0 }
 0x299   : > { %v1264_v5 = vmax.f32 %v1130_v3, 0.0  ;;  %v1868_v6 = vpop.f32.mrb[48].mxu1 }
 0x29a   : > { %1329 = vst [vmem:[%s2560_s10 + $0x178] sm:$0xff] %v1265_v4  ;;  %v1145_v7 = vadd.f32 %v1868_v6, %v2554_v52  ;;  %v1139_v8 = vpop.f32.mrb[49].mxu1 }
 0x29b   : > { %1328 = vst [vmem:[%s2560_s10 + $0x170] sm:$0xff] %v1264_v5  ;;  %v1140_v9 = vadd.f32 %v2554_v52, %v1139_v8 }
 0x29c   : > { %v1267_v10 = vmax.f32 %v1145_v7, 0.0 }
 0x29d   : > { %v1266_v11 = vmax.f32 %v1140_v9, 0.0  ;;  %v1871_v12 = vpop.f32.mrb[50].mxu1 }
 0x29e   : > { %1331 = vst [vmem:[%s2560_s10 + $0x188] sm:$0xff] %v1267_v10  ;;  %v1155_v13 = vadd.f32 %v1871_v12, %v2554_v52  ;;  %v1149_v14 = vpop.f32.mrb[51].mxu1 }
 0x29f   : > { %1330 = vst [vmem:[%s2560_s10 + $0x180] sm:$0xff] %v1266_v11  ;;  %v1150_v15 = vadd.f32 %v2554_v52, %v1149_v14 }
 0x2a0   : > { %v1269_v16 = vmax.f32 %v1155_v13, 0.0 }
 0x2a1   : > { %v1268_v17 = vmax.f32 %v1150_v15, 0.0  ;;  %v1874_v18 = vpop.f32.mrb[52].mxu1 }
 0x2a2   : > { %1333 = vst [vmem:[%s2560_s10 + $0x198] sm:$0xff] %v1269_v16  ;;  %v1165_v19 = vadd.f32 %v1874_v18, %v2554_v52  ;;  %v1159_v20 = vpop.f32.mrb[53].mxu1 }
 0x2a3   : > { %1332 = vst [vmem:[%s2560_s10 + $0x190] sm:$0xff] %v1268_v17  ;;  %v1160_v21 = vadd.f32 %v2554_v52, %v1159_v20 }
 0x2a4   : > { %v1271_v22 = vmax.f32 %v1165_v19, 0.0 }
 0x2a5   : > { %v1270_v23 = vmax.f32 %v1160_v21, 0.0  ;;  %v1877_v24 = vpop.f32.mrb[54].mxu1 }
 0x2a6   : > { %1335 = vst [vmem:[%s2560_s10 + $0x1a8] sm:$0xff] %v1271_v22  ;;  %v1175_v25 = vadd.f32 %v1877_v24, %v2554_v52  ;;  %v1169_v26 = vpop.f32.mrb[55].mxu1 }
 0x2a7   : > { %1334 = vst [vmem:[%s2560_s10 + $0x1a0] sm:$0xff] %v1270_v23  ;;  %v1170_v27 = vadd.f32 %v2554_v52, %v1169_v26 }
 0x2a8   : > { %v1273_v28 = vmax.f32 %v1175_v25, 0.0 }
 0x2a9   : > { %v1272_v29 = vmax.f32 %v1170_v27, 0.0  ;;  %v1880_v30 = vpop.f32.mrb[56].mxu1 }
 0x2aa   : > { %1337 = vst [vmem:[%s2560_s10 + $0x1b8] sm:$0xff] %v1273_v28  ;;  %v1185_v31 = vadd.f32 %v1880_v30, %v2554_v52  ;;  %v1179_v32 = vpop.f32.mrb[57].mxu1 }
 0x2ab   : > { %1336 = vst [vmem:[%s2560_s10 + $0x1b0] sm:$0xff] %v1272_v29  ;;  %v1180_v33 = vadd.f32 %v2554_v52, %v1179_v32 }
 0x2ac   : > { %v1275_v34 = vmax.f32 %v1185_v31, 0.0 }
 0x2ad   : > { %v1274_v35 = vmax.f32 %v1180_v33, 0.0  ;;  %v1883_v36 = vpop.f32.mrb[58].mxu1 }
 0x2ae   : > { %1339 = vst [vmem:[%s2560_s10 + $0x1c8] sm:$0xff] %v1275_v34  ;;  %v1195_v37 = vadd.f32 %v1883_v36, %v2554_v52  ;;  %v1189_v38 = vpop.f32.mrb[59].mxu1 }
 0x2af   : > { %1338 = vst [vmem:[%s2560_s10 + $0x1c0] sm:$0xff] %v1274_v35  ;;  %v1190_v39 = vadd.f32 %v2554_v52, %v1189_v38 }
 0x2b0   : > { %v1277_v40 = vmax.f32 %v1195_v37, 0.0 }
 0x2b1   : > { %v1276_v41 = vmax.f32 %v1190_v39, 0.0  ;;  %v1886_v42 = vpop.f32.mrb[60].mxu1 }
 0x2b2   : > { %1341 = vst [vmem:[%s2560_s10 + $0x1d8] sm:$0xff] %v1277_v40  ;;  %v1205_v43 = vadd.f32 %v1886_v42, %v2554_v52  ;;  %v1199_v44 = vpop.f32.mrb[61].mxu1 }
 0x2b3   : > { %1340 = vst [vmem:[%s2560_s10 + $0x1d0] sm:$0xff] %v1276_v41  ;;  %v1200_v45 = vadd.f32 %v2554_v52, %v1199_v44 }
 0x2b4   : > { %v1279_v46 = vmax.f32 %v1205_v43, 0.0 }
 0x2b5   : > { %v1278_v47 = vmax.f32 %v1200_v45, 0.0  ;;  %v1889_v49 = vpop.f32.mrb[62].mxu1 }
 0x2b6   : > { %1343 = vst [vmem:[%s2560_s10 + $0x1e8] sm:$0xff] %v1279_v46  ;;  %v1215_v50 = vadd.f32 %v1889_v49, %v2554_v52  ;;  %v1209_v51 = vpop.f32.mrb[63].mxu1 }
 0x2b7   : > { %1342 = vst [vmem:[%s2560_s10 + $0x1e0] sm:$0xff] %v1278_v47  ;;  %v1210_v53 = vadd.f32 %v2554_v52, %v1209_v51 }
 0x2b8   : > { %v1281_v54 = vmax.f32 %v1215_v50, 0.0 }
 0x2b9   : > { %v1280_v55 = vmax.f32 %v1210_v53, 0.0 }
 0x2ba   : > { %1345 = vst [vmem:[%s2560_s10 + $0x1f8] sm:$0xff] %v1281_v54 }
 0x2bb   : > { %1344 = vst [vmem:[%s2560_s10 + $0x1f0] sm:$0xff] %v1280_v55 }
 0x2bc   : > { %2124 = shalt.err (!%p2121_p1)
}
 0x2bd   : > { %s2125_s12 = scalar_lea.hbm %s2691_s11, 8192  ;;  %s2129_s15 = scalar_lea.hbm %s2744_s5, 16384 }
 0x2be   : > { %p2126_p13 = scmp.ne.s32.totalorder %s2691_s11, %s2125_s12  ;;  %p2130_p4 = scmp.lt.u32.totalorder %s2691_s11, %s2744_s5 }
 0x2bf   : > { %p2131_p5 = scmp.lt.u32.totalorder %s2129_s15, %s2125_s12  ;;  %p2133_p11 = scmp.lt.u32.totalorder %s2125_s12, %s2691_s11 }
 0x2c0   : > { %p2127_p6 = pnand %p2126_p13, %p2758_p0 }
 0x2c1   : > { %p2132_p8 = por %p2131_p5, %p2130_p4 }
 0x2c2   : > { %p2128_p10 = pneg %p2127_p6 }
 0x2c3   : > { %p2134_p2 = por %p2133_p11, %p2132_p8 }
 0x2c5   : > { %p2135_p3 = pnand %p2134_p2, %p2128_p10 }
 0x2c7   : > { %2138 = shalt.err (!%p2135_p3)
}
 0x2c8   : > { %s2189_s28 = smov 128   ;;  %s2190_s9 = smov 8  }
 0x2c9   : > { %1964 = dma.vmem_to_hbm [thread:$0]  (%p2758_p0), %s2693_s13, 8192, %s2691_s11, %s1347_s22, %s2189_s28, %s2189_s28, %s2190_s9  }
 0x2ca PF: > { %s1375_s30 = sand.u32 1, %s2169_s18   ;;  %p2759_p7 = scmp.ne.s32.totalorder %s2749_s25, 0 }
 0x2cb   : > { %p2760_p9 = scmp.ge.s32.totalorder %s2181_s21, 2  ;;  %s1376_s17 = scalar_lea.sflag [#allocation4], %s1375_s30 }
 0x2cd   : > { %p1978_p12 = pnand %p2760_p9, %p2759_p7 }
 0x2cf   : > { %2164 = dma.done.wait (!%p1978_p12), %s1376_s17, 8192  }
 0x2d0   : > { %2166 = vsyncadd (!%p1978_p12), %s1376_s17, 4294959104  ;;  %p19_p1 = scmp.ge.s32.totalorder %s2337_s29, 4   ;;  %s2761_s18 = smov %s2173_s19 }
 0x2d1   : > { %s2762_s19 = smov %s2177_s20  ;;  %s2763_s20 = smov %s2353_s27 }
 0x2d2   : > { %s2764_s21 = smov %s2337_s29  ;;  %21 = sbr.rel (!%p19_p1) target bundleno = 6 (0x6), region = 93 }
 0x2d9   :  { %1381 = vsyncpa [#allocation3], 1 }
 0x2da   :  { %1383 = vsyncpa [#allocation3 + $0x1], 1 }
 0x2db   :  { %1384 = vsyncpa [#allocation6], 1 }
 0x2dc   :  { %1385 = vsyncpa [#allocation4], 1 }
 0x2dd   :  { %1387 = vsyncpa [#allocation4 + $0x1], 1 }

</bundles_post_ra>
